<compile_context>
chip_gen: v6e
topology: v6e:2x2x1
jax: 0.10.0
libtpu: 0.0.40
codegen_flags: <defaults>
</compile_context>

<pallas_src>
import functools
import math

import jax
import jax.numpy as jnp
from jax.experimental import pallas as pl
from jax.experimental.pallas import tpu as pltpu

# ----------------------------- model config ---------------------------------
VOCAB = 64
HIDDEN = 32          # LM.config.hidden_size (small synthetic)
NH = 4               # attention heads
DH = HIDDEN // NH    # head dim
N_LAYERS = 2         # transformer layers
INTER = 64           # FFN intermediate size
MAX_POS = 32
CLS_HIDDEN = 32      # model_config['classifier_hidden_dim']
CLS_LAYERS = 2       # model_config['classifier_n_layers']
ACT = "relu"         # model_config['activation']
LN_EPS = 1e-12


# ----------------------------- fused Pallas kernel --------------------------


def _activate(y, act):
    if act == "gelu":
        # TODO(synk): HF BERT default is exact erf GELU; tanh approximation used
        # here (tiny numeric difference).
        c = math.sqrt(2.0 / math.pi)
        return 0.5 * y * (1.0 + jnp.tanh(c * (y + 0.044715 * y * y * y)))
    if act == "relu":
        return jnp.maximum(y, 0.0)
    if act == "tanh":
        return jnp.tanh(y)
    return y


def _fused_forward_kernel(*refs, n_layers, n_cls, act):
    """One grid program = one batch element. Entire forward fused in VMEM.

    refs layout:
      [0:16]            emb, mask, emb_ln_g, emb_ln_b,
                        wqkv, bqkv, wo, bo, ln1_g, ln1_b,
                        w1, b1, w2, b2, ln2_g, ln2_b
      [16:16+2*n_cls]   classifier (w, b) pairs
      [16+2*n_cls:]     emb_out_ref, logits_ref
    """
    (emb_ref, mask_ref, emb_g_ref, emb_b_ref,
     wqkv_ref, bqkv_ref, wo_ref, bo_ref,
     ln1g_ref, ln1b_ref, w1_ref, b1_ref, w2_ref, b2_ref,
     ln2g_ref, ln2b_ref) = refs[:16]
    cls_refs = refs[16:16 + 2 * n_cls]
    emb_out_ref, logits_ref = refs[16 + 2 * n_cls:]

    def layernorm(h, g, b):
        mu = jnp.mean(h, axis=-1, keepdims=True)
        d = h - mu
        var = jnp.mean(d * d, axis=-1, keepdims=True)
        return d * jax.lax.rsqrt(var + LN_EPS) * g + b

    # Embedding layernorm (pure LN path, no zero residual stream).
    x = layernorm(emb_ref[...], emb_g_ref[...], emb_b_ref[...])   # [S, H]
    add_mask = mask_ref[...]                                      # [1, S] additive
    scale = 1.0 / math.sqrt(DH)

    for l in range(n_layers):
        # ---- fused QKV projection: one [S,H] x [H,3H] matmul -------------
        qkv = (jnp.dot(x, wqkv_ref[l], preferred_element_type=jnp.float32)
               + bqkv_ref[l])                                     # [S, 3H]
        wo_l = wo_ref[l]                                          # [H, H]

        # ---- multi-head attention, static head loop; out-proj folded in --
        attn_out = None
        for h in range(NH):
            lo = h * DH
            qh = qkv[:, lo:lo + DH]                               # [S, DH]
            kh = qkv[:, HIDDEN + lo:HIDDEN + lo + DH]             # [S, DH]
            vh = qkv[:, 2 * HIDDEN + lo:2 * HIDDEN + lo + DH]     # [S, DH]
            s = jnp.dot(qh, kh.T, preferred_element_type=jnp.float32) * scale
            s = s + add_mask                                      # [S, S]
            s = s - jnp.max(s, axis=-1, keepdims=True)
            p = jnp.exp(s)
            p = p * pl.reciprocal(jnp.sum(p, axis=-1, keepdims=True),
                                  approx=True)
            o_h = jnp.dot(p, vh, preferred_element_type=jnp.float32)   # [S, DH]
            part = jnp.dot(o_h, wo_l[lo:lo + DH, :],
                           preferred_element_type=jnp.float32)         # [S, H]
            attn_out = part if attn_out is None else attn_out + part
        attn_out = attn_out + bo_ref[l]

        # ---- residual + LN -----------------------------------------------
        x = layernorm(attn_out + x, ln1g_ref[l], ln1b_ref[l])

        # ---- feed-forward block ------------------------------------------
        ffn = jnp.dot(x, w1_ref[l], preferred_element_type=jnp.float32) + b1_ref[l]
        ffn = _activate(ffn, "gelu")
        ffn = jnp.dot(ffn, w2_ref[l], preferred_element_type=jnp.float32) + b2_ref[l]
        x = layernorm(ffn + x, ln2g_ref[l], ln2b_ref[l])

    # ---- epilogue: mean-pool over sequence + classifier MLP --------------
    pooled = jnp.mean(x, axis=0, keepdims=True)                   # [1, H]
    emb_out_ref[...] = pooled

    hcls = pooled
    for i in range(n_cls):
        w_ref = cls_refs[2 * i]
        b_ref = cls_refs[2 * i + 1]
        hcls = jnp.dot(hcls, w_ref[...], preferred_element_type=jnp.float32) + b_ref[...]
        if i < n_cls - 1:
            hcls = _activate(hcls, act)
    logits_ref[...] = hcls                                        # [1, 2]


# ----------------------------- parameter init -------------------------------


def init_params(key):
    def norm(k, shape):
        return 0.02 * jax.random.normal(k, shape, dtype=jnp.float32)

    n_rand = 3 + N_LAYERS * 4 + CLS_LAYERS
    keys = iter(jax.random.split(key, n_rand))

    p = {
        "word_emb": norm(next(keys), (VOCAB, HIDDEN)),
        "pos_emb": norm(next(keys), (MAX_POS, HIDDEN)),
        "type_emb": norm(next(keys), (2, HIDDEN)),
        "emb_ln_g": jnp.ones((1, HIDDEN), jnp.float32),
        "emb_ln_b": jnp.zeros((1, HIDDEN), jnp.float32),
    }

    wqkv, wo, w1, w2 = [], [], [], []
    for _ in range(N_LAYERS):
        wqkv.append(norm(next(keys), (HIDDEN, 3 * HIDDEN)))   # fused Q|K|V
        wo.append(norm(next(keys), (HIDDEN, HIDDEN)))
        w1.append(norm(next(keys), (HIDDEN, INTER)))
        w2.append(norm(next(keys), (INTER, HIDDEN)))

    p["wqkv"] = jnp.stack(wqkv)                                  # [L, H, 3H]
    p["bqkv"] = jnp.zeros((N_LAYERS, 1, 3 * HIDDEN), jnp.float32)
    p["wo"] = jnp.stack(wo)                                      # [L, H, H]
    p["bo"] = jnp.zeros((N_LAYERS, 1, HIDDEN), jnp.float32)
    p["ln1_g"] = jnp.ones((N_LAYERS, 1, HIDDEN), jnp.float32)
    p["ln1_b"] = jnp.zeros((N_LAYERS, 1, HIDDEN), jnp.float32)
    p["w1"] = jnp.stack(w1)                                      # [L, H, INTER]
    p["b1"] = jnp.zeros((N_LAYERS, 1, INTER), jnp.float32)
    p["w2"] = jnp.stack(w2)                                      # [L, INTER, H]
    p["b2"] = jnp.zeros((N_LAYERS, 1, HIDDEN), jnp.float32)
    p["ln2_g"] = jnp.ones((N_LAYERS, 1, HIDDEN), jnp.float32)
    p["ln2_b"] = jnp.zeros((N_LAYERS, 1, HIDDEN), jnp.float32)

    # MLP classifier: [HIDDEN -> CLS_HIDDEN -> ... -> 2], act between layers.
    # TODO(synk): torch_geometric.nn.MLP also applies batch-norm + dropout
    # between layers by default; omitted here (inference-mode no-ops / plain MLP).
    dims = [HIDDEN] + [CLS_HIDDEN] * (CLS_LAYERS - 1) + [2]
    p["cls_w"], p["cls_b"] = [], []
    for i in range(CLS_LAYERS):
        p["cls_w"].append(norm(next(keys), (dims[i], dims[i + 1])))
        p["cls_b"].append(jnp.zeros((1, dims[i + 1]), jnp.float32))
    return p


# ----------------------------- forward pass ---------------------------------


def lm_model_forward(params, input_ids, attention_mask):
    """Returns (embedding.detach(), classifier(embedding)) like LM_Model.forward."""
    B, S = input_ids.shape
    H = HIDDEN
    L = N_LAYERS

    # Embedding gather (data-dependent) kept as XLA glue; everything after is
    # one fused Pallas kernel.
    emb = (
        params["word_emb"][input_ids]
        + params["pos_emb"][:S][None, :, :]
        + params["type_emb"][0][None, None, :]
    ).astype(jnp.float32)                                         # [B, S, H]
    add_mask = ((1.0 - attention_mask.astype(jnp.float32)) * -1e9
                ).reshape(B, 1, S)                                # additive mask

    def full(shape):
        return pl.BlockSpec(shape, lambda b, _n=len(shape): (0,) * _n)

    in_specs = [
        pl.BlockSpec((None, S, H), lambda b: (b, 0, 0)),          # emb (per batch)
        pl.BlockSpec((None, 1, S), lambda b: (b, 0, 0)),          # additive mask
        full((1, H)), full((1, H)),                               # emb LN g/b
        full((L, H, 3 * H)), full((L, 1, 3 * H)),                 # wqkv, bqkv
        full((L, H, H)), full((L, 1, H)),                         # wo, bo
        full((L, 1, H)), full((L, 1, H)),                         # ln1 g/b
        full((L, H, INTER)), full((L, 1, INTER)),                 # w1, b1
        full((L, INTER, H)), full((L, 1, H)),                     # w2, b2
        full((L, 1, H)), full((L, 1, H)),                         # ln2 g/b
    ]
    cls_args = []
    for w, b in zip(params["cls_w"], params["cls_b"]):
        in_specs.append(full(w.shape))
        in_specs.append(full(b.shape))
        cls_args += [w, b]

    out_shape = (
        jax.ShapeDtypeStruct((B, 1, H), jnp.float32),             # embedding
        jax.ShapeDtypeStruct((B, 1, 2), jnp.float32),             # logits
    )
    out_specs = (
        pl.BlockSpec((None, 1, H), lambda b: (b, 0, 0)),
        pl.BlockSpec((None, 1, 2), lambda b: (b, 0, 0)),
    )

    embedding, logits = pl.pallas_call(
        functools.partial(_fused_forward_kernel,
                          n_layers=L, n_cls=CLS_LAYERS, act=ACT),
        out_shape=out_shape,
        grid=(B,),
        in_specs=in_specs,
        out_specs=out_specs,
        compiler_params=pltpu.CompilerParams(
            dimension_semantics=("parallel",)),                   # v7x: 1 program/TC
    )(emb, add_mask, params["emb_ln_g"], params["emb_ln_b"],
      params["wqkv"], params["bqkv"], params["wo"], params["bo"],
      params["ln1_g"], params["ln1_b"], params["w1"], params["b1"],
      params["w2"], params["b2"], params["ln2_g"], params["ln2_b"],
      *cls_args)

    embedding = embedding.reshape(B, H)
    logits = logits.reshape(B, 2)
    return jax.lax.stop_gradient(embedding), logits  # (embedding.detach(), logits)


# ----------------------------- main ------------------------------------------

if __name__ == "__main__":
    key = jax.random.PRNGKey(0)
    k_param, k_ids = jax.random.split(key)

    params = init_params(k_param)

    B, S = 2, 8
    input_ids = jax.random.randint(k_ids, (B, S), 0, VOCAB, dtype=jnp.int32)
    attention_mask = jnp.ones((B, S), dtype=jnp.int32)

    embedding, logits = jax.jit(lm_model_forward)(params, input_ids, attention_mask)
    jax.block_until_ready((embedding, logits))

    assert embedding.shape == (B, HIDDEN) and logits.shape == (B, 2)
    assert bool(jnp.all(jnp.isfinite(embedding))) and bool(jnp.all(jnp.isfinite(logits)))
    print("KERNEL_OK")
</pallas_src>

<mosaic_0001>
module attributes {stable_mosaic.version = 11 : i64} {
  func.func @_fused_forward_kernel(%arg0: i32, %arg1: memref<1x8x32xf32, #tpu.memory_space<vmem>>, %arg2: memref<1x1x8xf32, #tpu.memory_space<vmem>>, %arg3: memref<1x32xf32, #tpu.memory_space<vmem>>, %arg4: memref<1x32xf32, #tpu.memory_space<vmem>>, %arg5: memref<2x32x96xf32, #tpu.memory_space<vmem>>, %arg6: memref<2x1x96xf32, #tpu.memory_space<vmem>>, %arg7: memref<2x32x32xf32, #tpu.memory_space<vmem>>, %arg8: memref<2x1x32xf32, #tpu.memory_space<vmem>>, %arg9: memref<2x1x32xf32, #tpu.memory_space<vmem>>, %arg10: memref<2x1x32xf32, #tpu.memory_space<vmem>>, %arg11: memref<2x32x64xf32, #tpu.memory_space<vmem>>, %arg12: memref<2x1x64xf32, #tpu.memory_space<vmem>>, %arg13: memref<2x64x32xf32, #tpu.memory_space<vmem>>, %arg14: memref<2x1x32xf32, #tpu.memory_space<vmem>>, %arg15: memref<2x1x32xf32, #tpu.memory_space<vmem>>, %arg16: memref<2x1x32xf32, #tpu.memory_space<vmem>>, %arg17: memref<32x32xf32, #tpu.memory_space<vmem>>, %arg18: memref<1x32xf32, #tpu.memory_space<vmem>>, %arg19: memref<32x2xf32, #tpu.memory_space<vmem>>, %arg20: memref<1x2xf32, #tpu.memory_space<vmem>>, %arg21: memref<1x1x32xf32, #tpu.memory_space<vmem>>, %arg22: memref<1x1x2xf32, #tpu.memory_space<vmem>>) attributes {dimension_semantics = [#tpu.dimension_semantics<parallel>], iteration_bounds = array<i64: 2>, scalar_prefetch = 0 : i64, scratch_operands = 0 : i64, tpu.core_type = #tpu.core_type<tc>, window_params = [{transform_indices = @transform_0, window_bounds = array<i64: 1, 8, 32>}, {transform_indices = @transform_1, window_bounds = array<i64: 1, 1, 8>}, {pipeline_mode = #tpu.pipeline_mode<synchronous>, transform_indices = @transform_2, window_bounds = array<i64: 1, 32>}, {pipeline_mode = #tpu.pipeline_mode<synchronous>, transform_indices = @transform_3, window_bounds = array<i64: 1, 32>}, {pipeline_mode = #tpu.pipeline_mode<synchronous>, transform_indices = @transform_4, window_bounds = array<i64: 2, 32, 96>}, {pipeline_mode = #tpu.pipeline_mode<synchronous>, transform_indices = @transform_5, window_bounds = array<i64: 2, 1, 96>}, {pipeline_mode = #tpu.pipeline_mode<synchronous>, transform_indices = @transform_6, window_bounds = array<i64: 2, 32, 32>}, {pipeline_mode = #tpu.pipeline_mode<synchronous>, transform_indices = @transform_7, window_bounds = array<i64: 2, 1, 32>}, {pipeline_mode = #tpu.pipeline_mode<synchronous>, transform_indices = @transform_8, window_bounds = array<i64: 2, 1, 32>}, {pipeline_mode = #tpu.pipeline_mode<synchronous>, transform_indices = @transform_9, window_bounds = array<i64: 2, 1, 32>}, {pipeline_mode = #tpu.pipeline_mode<synchronous>, transform_indices = @transform_10, window_bounds = array<i64: 2, 32, 64>}, {pipeline_mode = #tpu.pipeline_mode<synchronous>, transform_indices = @transform_11, window_bounds = array<i64: 2, 1, 64>}, {pipeline_mode = #tpu.pipeline_mode<synchronous>, transform_indices = @transform_12, window_bounds = array<i64: 2, 64, 32>}, {pipeline_mode = #tpu.pipeline_mode<synchronous>, transform_indices = @transform_13, window_bounds = array<i64: 2, 1, 32>}, {pipeline_mode = #tpu.pipeline_mode<synchronous>, transform_indices = @transform_14, window_bounds = array<i64: 2, 1, 32>}, {pipeline_mode = #tpu.pipeline_mode<synchronous>, transform_indices = @transform_15, window_bounds = array<i64: 2, 1, 32>}, {pipeline_mode = #tpu.pipeline_mode<synchronous>, transform_indices = @transform_16, window_bounds = array<i64: 32, 32>}, {pipeline_mode = #tpu.pipeline_mode<synchronous>, transform_indices = @transform_17, window_bounds = array<i64: 1, 32>}, {pipeline_mode = #tpu.pipeline_mode<synchronous>, transform_indices = @transform_18, window_bounds = array<i64: 32, 2>}, {pipeline_mode = #tpu.pipeline_mode<synchronous>, transform_indices = @transform_19, window_bounds = array<i64: 1, 2>}, {transform_indices = @transform_20, window_bounds = array<i64: 1, 1, 32>}, {transform_indices = @transform_21, window_bounds = array<i64: 1, 1, 2>}]} {
    %c0 = arith.constant 0 : index
    %c0_0 = arith.constant 0 : index
    %c0_1 = arith.constant 0 : index
    %0 = vector.load %arg1[%c0, %c0_0, %c0_1] : memref<1x8x32xf32, #tpu.memory_space<vmem>>, vector<1x8x32xf32>
    %1 = vector.shape_cast %0 : vector<1x8x32xf32> to vector<8x32xf32>
    %c0_2 = arith.constant 0 : index
    %c0_3 = arith.constant 0 : index
    %2 = vector.load %arg3[%c0_2, %c0_3] : memref<1x32xf32, #tpu.memory_space<vmem>>, vector<1x32xf32>
    %c0_4 = arith.constant 0 : index
    %c0_5 = arith.constant 0 : index
    %3 = vector.load %arg4[%c0_4, %c0_5] : memref<1x32xf32, #tpu.memory_space<vmem>>, vector<1x32xf32>
    %cst = arith.constant dense<0.000000e+00> : vector<8xf32>
    %4 = vector.multi_reduction <add>, %1, %cst [1] : vector<8x32xf32> to vector<8xf32>
    %5 = vector.shape_cast %4 : vector<8xf32> to vector<8x1xf32>
    %cst_6 = arith.constant 3.200000e+01 : f32
    %6 = vector.broadcast %cst_6 : f32 to vector<8x1xf32>
    %7 = arith.divf %5, %6 : vector<8x1xf32>
    %8 = vector.broadcast %7 : vector<8x1xf32> to vector<8x32xf32>
    %9 = arith.subf %1, %8 : vector<8x32xf32>
    %10 = arith.mulf %9, %9 : vector<8x32xf32>
    %cst_7 = arith.constant dense<0.000000e+00> : vector<8xf32>
    %11 = vector.multi_reduction <add>, %10, %cst_7 [1] : vector<8x32xf32> to vector<8xf32>
    %12 = vector.shape_cast %11 : vector<8xf32> to vector<8x1xf32>
    %cst_8 = arith.constant 3.200000e+01 : f32
    %13 = vector.broadcast %cst_8 : f32 to vector<8x1xf32>
    %14 = arith.divf %12, %13 : vector<8x1xf32>
    %cst_9 = arith.constant 9.99999996E-13 : f32
    %15 = vector.broadcast %cst_9 : f32 to vector<8x1xf32>
    %16 = arith.addf %14, %15 : vector<8x1xf32>
    %17 = math.rsqrt %16 : vector<8x1xf32>
    %18 = vector.broadcast %17 : vector<8x1xf32> to vector<8x32xf32>
    %19 = arith.mulf %9, %18 : vector<8x32xf32>
    %20 = vector.broadcast %2 : vector<1x32xf32> to vector<8x32xf32>
    %21 = arith.mulf %19, %20 : vector<8x32xf32>
    %22 = vector.broadcast %3 : vector<1x32xf32> to vector<8x32xf32>
    %23 = arith.addf %21, %22 : vector<8x32xf32>
    %c0_10 = arith.constant 0 : index
    %c0_11 = arith.constant 0 : index
    %c0_12 = arith.constant 0 : index
    %24 = vector.load %arg2[%c0_10, %c0_11, %c0_12] : memref<1x1x8xf32, #tpu.memory_space<vmem>>, vector<1x1x8xf32>
    %25 = vector.shape_cast %24 : vector<1x1x8xf32> to vector<1x8xf32>
    %c0_13 = arith.constant 0 : index
    %c0_14 = arith.constant 0 : index
    %c0_15 = arith.constant 0 : index
    %26 = vector.load %arg5[%c0_13, %c0_14, %c0_15] : memref<2x32x96xf32, #tpu.memory_space<vmem>>, vector<1x32x96xf32>
    %27 = vector.shape_cast %26 : vector<1x32x96xf32> to vector<32x96xf32>
    %cst_16 = arith.constant dense<0.000000e+00> : vector<8x96xf32>
    %28 = tpu.matmul %23, %27, %cst_16 {dimension_numbers = #tpu.dot_dimension_numbers<[1], [0], [0], [1], [0, 0, 1, 1], [], []>} : vector<8x32xf32>, vector<32x96xf32>, vector<8x96xf32> -> vector<8x96xf32>
    %c0_17 = arith.constant 0 : index
    %c0_18 = arith.constant 0 : index
    %c0_19 = arith.constant 0 : index
    %29 = vector.load %arg6[%c0_17, %c0_18, %c0_19] : memref<2x1x96xf32, #tpu.memory_space<vmem>>, vector<1x1x96xf32>
    %30 = vector.shape_cast %29 : vector<1x1x96xf32> to vector<1x96xf32>
    %31 = vector.broadcast %30 : vector<1x96xf32> to vector<8x96xf32>
    %32 = arith.addf %28, %31 : vector<8x96xf32>
    %c0_20 = arith.constant 0 : index
    %c0_21 = arith.constant 0 : index
    %c0_22 = arith.constant 0 : index
    %33 = vector.load %arg7[%c0_20, %c0_21, %c0_22] : memref<2x32x32xf32, #tpu.memory_space<vmem>>, vector<1x32x32xf32>
    %34 = vector.shape_cast %33 : vector<1x32x32xf32> to vector<32x32xf32>
    %35 = vector.extract_strided_slice %32 {offsets = [0, 0], sizes = [8, 8], strides = [1, 1]} : vector<8x96xf32> to vector<8x8xf32>
    %36 = vector.extract_strided_slice %32 {offsets = [0, 32], sizes = [8, 8], strides = [1, 1]} : vector<8x96xf32> to vector<8x8xf32>
    %37 = vector.extract_strided_slice %32 {offsets = [0, 64], sizes = [8, 8], strides = [1, 1]} : vector<8x96xf32> to vector<8x8xf32>
    %38 = tpu.transpose %36, [1, 0] : vector<8x8xf32> -> vector<8x8xf32>
    %cst_23 = arith.constant dense<0.000000e+00> : vector<8x8xf32>
    %39 = tpu.matmul %35, %38, %cst_23 {dimension_numbers = #tpu.dot_dimension_numbers<[1], [0], [0], [1], [0, 0, 1, 1], [], []>} : vector<8x8xf32>, vector<8x8xf32>, vector<8x8xf32> -> vector<8x8xf32>
    %cst_24 = arith.constant 0.353553385 : f32
    %40 = vector.broadcast %cst_24 : f32 to vector<8x8xf32>
    %41 = arith.mulf %39, %40 : vector<8x8xf32>
    %42 = vector.broadcast %25 : vector<1x8xf32> to vector<8x8xf32>
    %43 = arith.addf %41, %42 : vector<8x8xf32>
    %cst_25 = arith.constant dense<0xFF800000> : vector<8xf32>
    %44 = vector.multi_reduction <maximumf>, %43, %cst_25 [1] : vector<8x8xf32> to vector<8xf32>
    %45 = vector.shape_cast %44 : vector<8xf32> to vector<8x1xf32>
    %46 = vector.broadcast %45 : vector<8x1xf32> to vector<8x8xf32>
    %47 = arith.subf %43, %46 : vector<8x8xf32>
    %48 = math.exp %47 : vector<8x8xf32>
    %cst_26 = arith.constant dense<0.000000e+00> : vector<8xf32>
    %49 = vector.multi_reduction <add>, %48, %cst_26 [1] : vector<8x8xf32> to vector<8xf32>
    %50 = vector.shape_cast %49 : vector<8xf32> to vector<8x1xf32>
    %51 = tpu.reciprocal %50 {approx = true} : vector<8x1xf32> -> vector<8x1xf32>
    %52 = vector.broadcast %51 : vector<8x1xf32> to vector<8x8xf32>
    %53 = arith.mulf %48, %52 : vector<8x8xf32>
    %cst_27 = arith.constant dense<0.000000e+00> : vector<8x8xf32>
    %54 = tpu.matmul %53, %37, %cst_27 {dimension_numbers = #tpu.dot_dimension_numbers<[1], [0], [0], [1], [0, 0, 1, 1], [], []>} : vector<8x8xf32>, vector<8x8xf32>, vector<8x8xf32> -> vector<8x8xf32>
    %55 = vector.extract_strided_slice %34 {offsets = [0, 0], sizes = [8, 32], strides = [1, 1]} : vector<32x32xf32> to vector<8x32xf32>
    %cst_28 = arith.constant dense<0.000000e+00> : vector<8x32xf32>
    %56 = tpu.matmul %54, %55, %cst_28 {dimension_numbers = #tpu.dot_dimension_numbers<[1], [0], [0], [1], [0, 0, 1, 1], [], []>} : vector<8x8xf32>, vector<8x32xf32>, vector<8x32xf32> -> vector<8x32xf32>
    %57 = vector.extract_strided_slice %32 {offsets = [0, 8], sizes = [8, 8], strides = [1, 1]} : vector<8x96xf32> to vector<8x8xf32>
    %58 = vector.extract_strided_slice %32 {offsets = [0, 40], sizes = [8, 8], strides = [1, 1]} : vector<8x96xf32> to vector<8x8xf32>
    %59 = vector.extract_strided_slice %32 {offsets = [0, 72], sizes = [8, 8], strides = [1, 1]} : vector<8x96xf32> to vector<8x8xf32>
    %60 = tpu.transpose %58, [1, 0] : vector<8x8xf32> -> vector<8x8xf32>
    %cst_29 = arith.constant dense<0.000000e+00> : vector<8x8xf32>
    %61 = tpu.matmul %57, %60, %cst_29 {dimension_numbers = #tpu.dot_dimension_numbers<[1], [0], [0], [1], [0, 0, 1, 1], [], []>} : vector<8x8xf32>, vector<8x8xf32>, vector<8x8xf32> -> vector<8x8xf32>
    %cst_30 = arith.constant 0.353553385 : f32
    %62 = vector.broadcast %cst_30 : f32 to vector<8x8xf32>
    %63 = arith.mulf %61, %62 : vector<8x8xf32>
    %64 = vector.broadcast %25 : vector<1x8xf32> to vector<8x8xf32>
    %65 = arith.addf %63, %64 : vector<8x8xf32>
    %cst_31 = arith.constant dense<0xFF800000> : vector<8xf32>
    %66 = vector.multi_reduction <maximumf>, %65, %cst_31 [1] : vector<8x8xf32> to vector<8xf32>
    %67 = vector.shape_cast %66 : vector<8xf32> to vector<8x1xf32>
    %68 = vector.broadcast %67 : vector<8x1xf32> to vector<8x8xf32>
    %69 = arith.subf %65, %68 : vector<8x8xf32>
    %70 = math.exp %69 : vector<8x8xf32>
    %cst_32 = arith.constant dense<0.000000e+00> : vector<8xf32>
    %71 = vector.multi_reduction <add>, %70, %cst_32 [1] : vector<8x8xf32> to vector<8xf32>
    %72 = vector.shape_cast %71 : vector<8xf32> to vector<8x1xf32>
    %73 = tpu.reciprocal %72 {approx = true} : vector<8x1xf32> -> vector<8x1xf32>
    %74 = vector.broadcast %73 : vector<8x1xf32> to vector<8x8xf32>
    %75 = arith.mulf %70, %74 : vector<8x8xf32>
    %cst_33 = arith.constant dense<0.000000e+00> : vector<8x8xf32>
    %76 = tpu.matmul %75, %59, %cst_33 {dimension_numbers = #tpu.dot_dimension_numbers<[1], [0], [0], [1], [0, 0, 1, 1], [], []>} : vector<8x8xf32>, vector<8x8xf32>, vector<8x8xf32> -> vector<8x8xf32>
    %77 = vector.extract_strided_slice %34 {offsets = [8, 0], sizes = [8, 32], strides = [1, 1]} : vector<32x32xf32> to vector<8x32xf32>
    %cst_34 = arith.constant dense<0.000000e+00> : vector<8x32xf32>
    %78 = tpu.matmul %76, %77, %cst_34 {dimension_numbers = #tpu.dot_dimension_numbers<[1], [0], [0], [1], [0, 0, 1, 1], [], []>} : vector<8x8xf32>, vector<8x32xf32>, vector<8x32xf32> -> vector<8x32xf32>
    %79 = arith.addf %56, %78 : vector<8x32xf32>
    %80 = vector.extract_strided_slice %32 {offsets = [0, 16], sizes = [8, 8], strides = [1, 1]} : vector<8x96xf32> to vector<8x8xf32>
    %81 = vector.extract_strided_slice %32 {offsets = [0, 48], sizes = [8, 8], strides = [1, 1]} : vector<8x96xf32> to vector<8x8xf32>
    %82 = vector.extract_strided_slice %32 {offsets = [0, 80], sizes = [8, 8], strides = [1, 1]} : vector<8x96xf32> to vector<8x8xf32>
    %83 = tpu.transpose %81, [1, 0] : vector<8x8xf32> -> vector<8x8xf32>
    %cst_35 = arith.constant dense<0.000000e+00> : vector<8x8xf32>
    %84 = tpu.matmul %80, %83, %cst_35 {dimension_numbers = #tpu.dot_dimension_numbers<[1], [0], [0], [1], [0, 0, 1, 1], [], []>} : vector<8x8xf32>, vector<8x8xf32>, vector<8x8xf32> -> vector<8x8xf32>
    %cst_36 = arith.constant 0.353553385 : f32
    %85 = vector.broadcast %cst_36 : f32 to vector<8x8xf32>
    %86 = arith.mulf %84, %85 : vector<8x8xf32>
    %87 = vector.broadcast %25 : vector<1x8xf32> to vector<8x8xf32>
    %88 = arith.addf %86, %87 : vector<8x8xf32>
    %cst_37 = arith.constant dense<0xFF800000> : vector<8xf32>
    %89 = vector.multi_reduction <maximumf>, %88, %cst_37 [1] : vector<8x8xf32> to vector<8xf32>
    %90 = vector.shape_cast %89 : vector<8xf32> to vector<8x1xf32>
    %91 = vector.broadcast %90 : vector<8x1xf32> to vector<8x8xf32>
    %92 = arith.subf %88, %91 : vector<8x8xf32>
    %93 = math.exp %92 : vector<8x8xf32>
    %cst_38 = arith.constant dense<0.000000e+00> : vector<8xf32>
    %94 = vector.multi_reduction <add>, %93, %cst_38 [1] : vector<8x8xf32> to vector<8xf32>
    %95 = vector.shape_cast %94 : vector<8xf32> to vector<8x1xf32>
    %96 = tpu.reciprocal %95 {approx = true} : vector<8x1xf32> -> vector<8x1xf32>
    %97 = vector.broadcast %96 : vector<8x1xf32> to vector<8x8xf32>
    %98 = arith.mulf %93, %97 : vector<8x8xf32>
    %cst_39 = arith.constant dense<0.000000e+00> : vector<8x8xf32>
    %99 = tpu.matmul %98, %82, %cst_39 {dimension_numbers = #tpu.dot_dimension_numbers<[1], [0], [0], [1], [0, 0, 1, 1], [], []>} : vector<8x8xf32>, vector<8x8xf32>, vector<8x8xf32> -> vector<8x8xf32>
    %100 = vector.extract_strided_slice %34 {offsets = [16, 0], sizes = [8, 32], strides = [1, 1]} : vector<32x32xf32> to vector<8x32xf32>
    %cst_40 = arith.constant dense<0.000000e+00> : vector<8x32xf32>
    %101 = tpu.matmul %99, %100, %cst_40 {dimension_numbers = #tpu.dot_dimension_numbers<[1], [0], [0], [1], [0, 0, 1, 1], [], []>} : vector<8x8xf32>, vector<8x32xf32>, vector<8x32xf32> -> vector<8x32xf32>
    %102 = arith.addf %79, %101 : vector<8x32xf32>
    %103 = vector.extract_strided_slice %32 {offsets = [0, 24], sizes = [8, 8], strides = [1, 1]} : vector<8x96xf32> to vector<8x8xf32>
    %104 = vector.extract_strided_slice %32 {offsets = [0, 56], sizes = [8, 8], strides = [1, 1]} : vector<8x96xf32> to vector<8x8xf32>
    %105 = vector.extract_strided_slice %32 {offsets = [0, 88], sizes = [8, 8], strides = [1, 1]} : vector<8x96xf32> to vector<8x8xf32>
    %106 = tpu.transpose %104, [1, 0] : vector<8x8xf32> -> vector<8x8xf32>
    %cst_41 = arith.constant dense<0.000000e+00> : vector<8x8xf32>
    %107 = tpu.matmul %103, %106, %cst_41 {dimension_numbers = #tpu.dot_dimension_numbers<[1], [0], [0], [1], [0, 0, 1, 1], [], []>} : vector<8x8xf32>, vector<8x8xf32>, vector<8x8xf32> -> vector<8x8xf32>
    %cst_42 = arith.constant 0.353553385 : f32
    %108 = vector.broadcast %cst_42 : f32 to vector<8x8xf32>
    %109 = arith.mulf %107, %108 : vector<8x8xf32>
    %110 = vector.broadcast %25 : vector<1x8xf32> to vector<8x8xf32>
    %111 = arith.addf %109, %110 : vector<8x8xf32>
    %cst_43 = arith.constant dense<0xFF800000> : vector<8xf32>
    %112 = vector.multi_reduction <maximumf>, %111, %cst_43 [1] : vector<8x8xf32> to vector<8xf32>
    %113 = vector.shape_cast %112 : vector<8xf32> to vector<8x1xf32>
    %114 = vector.broadcast %113 : vector<8x1xf32> to vector<8x8xf32>
    %115 = arith.subf %111, %114 : vector<8x8xf32>
    %116 = math.exp %115 : vector<8x8xf32>
    %cst_44 = arith.constant dense<0.000000e+00> : vector<8xf32>
    %117 = vector.multi_reduction <add>, %116, %cst_44 [1] : vector<8x8xf32> to vector<8xf32>
    %118 = vector.shape_cast %117 : vector<8xf32> to vector<8x1xf32>
    %119 = tpu.reciprocal %118 {approx = true} : vector<8x1xf32> -> vector<8x1xf32>
    %120 = vector.broadcast %119 : vector<8x1xf32> to vector<8x8xf32>
    %121 = arith.mulf %116, %120 : vector<8x8xf32>
    %cst_45 = arith.constant dense<0.000000e+00> : vector<8x8xf32>
    %122 = tpu.matmul %121, %105, %cst_45 {dimension_numbers = #tpu.dot_dimension_numbers<[1], [0], [0], [1], [0, 0, 1, 1], [], []>} : vector<8x8xf32>, vector<8x8xf32>, vector<8x8xf32> -> vector<8x8xf32>
    %123 = vector.extract_strided_slice %34 {offsets = [24, 0], sizes = [8, 32], strides = [1, 1]} : vector<32x32xf32> to vector<8x32xf32>
    %cst_46 = arith.constant dense<0.000000e+00> : vector<8x32xf32>
    %124 = tpu.matmul %122, %123, %cst_46 {dimension_numbers = #tpu.dot_dimension_numbers<[1], [0], [0], [1], [0, 0, 1, 1], [], []>} : vector<8x8xf32>, vector<8x32xf32>, vector<8x32xf32> -> vector<8x32xf32>
    %125 = arith.addf %102, %124 : vector<8x32xf32>
    %c0_47 = arith.constant 0 : index
    %c0_48 = arith.constant 0 : index
    %c0_49 = arith.constant 0 : index
    %126 = vector.load %arg8[%c0_47, %c0_48, %c0_49] : memref<2x1x32xf32, #tpu.memory_space<vmem>>, vector<1x1x32xf32>
    %127 = vector.shape_cast %126 : vector<1x1x32xf32> to vector<1x32xf32>
    %128 = vector.broadcast %127 : vector<1x32xf32> to vector<8x32xf32>
    %129 = arith.addf %125, %128 : vector<8x32xf32>
    %130 = arith.addf %129, %23 : vector<8x32xf32>
    %c0_50 = arith.constant 0 : index
    %c0_51 = arith.constant 0 : index
    %c0_52 = arith.constant 0 : index
    %131 = vector.load %arg9[%c0_50, %c0_51, %c0_52] : memref<2x1x32xf32, #tpu.memory_space<vmem>>, vector<1x1x32xf32>
    %132 = vector.shape_cast %131 : vector<1x1x32xf32> to vector<1x32xf32>
    %c0_53 = arith.constant 0 : index
    %c0_54 = arith.constant 0 : index
    %c0_55 = arith.constant 0 : index
    %133 = vector.load %arg10[%c0_53, %c0_54, %c0_55] : memref<2x1x32xf32, #tpu.memory_space<vmem>>, vector<1x1x32xf32>
    %134 = vector.shape_cast %133 : vector<1x1x32xf32> to vector<1x32xf32>
    %cst_56 = arith.constant dense<0.000000e+00> : vector<8xf32>
    %135 = vector.multi_reduction <add>, %130, %cst_56 [1] : vector<8x32xf32> to vector<8xf32>
    %136 = vector.shape_cast %135 : vector<8xf32> to vector<8x1xf32>
    %cst_57 = arith.constant 3.200000e+01 : f32
    %137 = vector.broadcast %cst_57 : f32 to vector<8x1xf32>
    %138 = arith.divf %136, %137 : vector<8x1xf32>
    %139 = vector.broadcast %138 : vector<8x1xf32> to vector<8x32xf32>
    %140 = arith.subf %130, %139 : vector<8x32xf32>
    %141 = arith.mulf %140, %140 : vector<8x32xf32>
    %cst_58 = arith.constant dense<0.000000e+00> : vector<8xf32>
    %142 = vector.multi_reduction <add>, %141, %cst_58 [1] : vector<8x32xf32> to vector<8xf32>
    %143 = vector.shape_cast %142 : vector<8xf32> to vector<8x1xf32>
    %cst_59 = arith.constant 3.200000e+01 : f32
    %144 = vector.broadcast %cst_59 : f32 to vector<8x1xf32>
    %145 = arith.divf %143, %144 : vector<8x1xf32>
    %cst_60 = arith.constant 9.99999996E-13 : f32
    %146 = vector.broadcast %cst_60 : f32 to vector<8x1xf32>
    %147 = arith.addf %145, %146 : vector<8x1xf32>
    %148 = math.rsqrt %147 : vector<8x1xf32>
    %149 = vector.broadcast %148 : vector<8x1xf32> to vector<8x32xf32>
    %150 = arith.mulf %140, %149 : vector<8x32xf32>
    %151 = vector.broadcast %132 : vector<1x32xf32> to vector<8x32xf32>
    %152 = arith.mulf %150, %151 : vector<8x32xf32>
    %153 = vector.broadcast %134 : vector<1x32xf32> to vector<8x32xf32>
    %154 = arith.addf %152, %153 : vector<8x32xf32>
    %c0_61 = arith.constant 0 : index
    %c0_62 = arith.constant 0 : index
    %c0_63 = arith.constant 0 : index
    %155 = vector.load %arg11[%c0_61, %c0_62, %c0_63] : memref<2x32x64xf32, #tpu.memory_space<vmem>>, vector<1x32x64xf32>
    %156 = vector.shape_cast %155 : vector<1x32x64xf32> to vector<32x64xf32>
    %cst_64 = arith.constant dense<0.000000e+00> : vector<8x64xf32>
    %157 = tpu.matmul %154, %156, %cst_64 {dimension_numbers = #tpu.dot_dimension_numbers<[1], [0], [0], [1], [0, 0, 1, 1], [], []>} : vector<8x32xf32>, vector<32x64xf32>, vector<8x64xf32> -> vector<8x64xf32>
    %c0_65 = arith.constant 0 : index
    %c0_66 = arith.constant 0 : index
    %c0_67 = arith.constant 0 : index
    %158 = vector.load %arg12[%c0_65, %c0_66, %c0_67] : memref<2x1x64xf32, #tpu.memory_space<vmem>>, vector<1x1x64xf32>
    %159 = vector.shape_cast %158 : vector<1x1x64xf32> to vector<1x64xf32>
    %160 = vector.broadcast %159 : vector<1x64xf32> to vector<8x64xf32>
    %161 = arith.addf %157, %160 : vector<8x64xf32>
    %cst_68 = arith.constant 5.000000e-01 : f32
    %162 = vector.broadcast %cst_68 : f32 to vector<8x64xf32>
    %163 = arith.mulf %162, %161 : vector<8x64xf32>
    %cst_69 = arith.constant 4.471500e-02 : f32
    %164 = vector.broadcast %cst_69 : f32 to vector<8x64xf32>
    %165 = arith.mulf %164, %161 : vector<8x64xf32>
    %166 = arith.mulf %165, %161 : vector<8x64xf32>
    %167 = arith.mulf %166, %161 : vector<8x64xf32>
    %168 = arith.addf %161, %167 : vector<8x64xf32>
    %cst_70 = arith.constant 0.797884583 : f32
    %169 = vector.broadcast %cst_70 : f32 to vector<8x64xf32>
    %170 = arith.mulf %169, %168 : vector<8x64xf32>
    %171 = math.tanh %170 : vector<8x64xf32>
    %cst_71 = arith.constant 1.000000e+00 : f32
    %172 = vector.broadcast %cst_71 : f32 to vector<8x64xf32>
    %173 = arith.addf %172, %171 : vector<8x64xf32>
    %174 = arith.mulf %163, %173 : vector<8x64xf32>
    %c0_72 = arith.constant 0 : index
    %c0_73 = arith.constant 0 : index
    %c0_74 = arith.constant 0 : index
    %175 = vector.load %arg13[%c0_72, %c0_73, %c0_74] : memref<2x64x32xf32, #tpu.memory_space<vmem>>, vector<1x64x32xf32>
    %176 = vector.shape_cast %175 : vector<1x64x32xf32> to vector<64x32xf32>
    %cst_75 = arith.constant dense<0.000000e+00> : vector<8x32xf32>
    %177 = tpu.matmul %174, %176, %cst_75 {dimension_numbers = #tpu.dot_dimension_numbers<[1], [0], [0], [1], [0, 0, 1, 1], [], []>} : vector<8x64xf32>, vector<64x32xf32>, vector<8x32xf32> -> vector<8x32xf32>
    %c0_76 = arith.constant 0 : index
    %c0_77 = arith.constant 0 : index
    %c0_78 = arith.constant 0 : index
    %178 = vector.load %arg14[%c0_76, %c0_77, %c0_78] : memref<2x1x32xf32, #tpu.memory_space<vmem>>, vector<1x1x32xf32>
    %179 = vector.shape_cast %178 : vector<1x1x32xf32> to vector<1x32xf32>
    %180 = vector.broadcast %179 : vector<1x32xf32> to vector<8x32xf32>
    %181 = arith.addf %177, %180 : vector<8x32xf32>
    %182 = arith.addf %181, %154 : vector<8x32xf32>
    %c0_79 = arith.constant 0 : index
    %c0_80 = arith.constant 0 : index
    %c0_81 = arith.constant 0 : index
    %183 = vector.load %arg15[%c0_79, %c0_80, %c0_81] : memref<2x1x32xf32, #tpu.memory_space<vmem>>, vector<1x1x32xf32>
    %184 = vector.shape_cast %183 : vector<1x1x32xf32> to vector<1x32xf32>
    %c0_82 = arith.constant 0 : index
    %c0_83 = arith.constant 0 : index
    %c0_84 = arith.constant 0 : index
    %185 = vector.load %arg16[%c0_82, %c0_83, %c0_84] : memref<2x1x32xf32, #tpu.memory_space<vmem>>, vector<1x1x32xf32>
    %186 = vector.shape_cast %185 : vector<1x1x32xf32> to vector<1x32xf32>
    %cst_85 = arith.constant dense<0.000000e+00> : vector<8xf32>
    %187 = vector.multi_reduction <add>, %182, %cst_85 [1] : vector<8x32xf32> to vector<8xf32>
    %188 = vector.shape_cast %187 : vector<8xf32> to vector<8x1xf32>
    %cst_86 = arith.constant 3.200000e+01 : f32
    %189 = vector.broadcast %cst_86 : f32 to vector<8x1xf32>
    %190 = arith.divf %188, %189 : vector<8x1xf32>
    %191 = vector.broadcast %190 : vector<8x1xf32> to vector<8x32xf32>
    %192 = arith.subf %182, %191 : vector<8x32xf32>
    %193 = arith.mulf %192, %192 : vector<8x32xf32>
    %cst_87 = arith.constant dense<0.000000e+00> : vector<8xf32>
    %194 = vector.multi_reduction <add>, %193, %cst_87 [1] : vector<8x32xf32> to vector<8xf32>
    %195 = vector.shape_cast %194 : vector<8xf32> to vector<8x1xf32>
    %cst_88 = arith.constant 3.200000e+01 : f32
    %196 = vector.broadcast %cst_88 : f32 to vector<8x1xf32>
    %197 = arith.divf %195, %196 : vector<8x1xf32>
    %cst_89 = arith.constant 9.99999996E-13 : f32
    %198 = vector.broadcast %cst_89 : f32 to vector<8x1xf32>
    %199 = arith.addf %197, %198 : vector<8x1xf32>
    %200 = math.rsqrt %199 : vector<8x1xf32>
    %201 = vector.broadcast %200 : vector<8x1xf32> to vector<8x32xf32>
    %202 = arith.mulf %192, %201 : vector<8x32xf32>
    %203 = vector.broadcast %184 : vector<1x32xf32> to vector<8x32xf32>
    %204 = arith.mulf %202, %203 : vector<8x32xf32>
    %205 = vector.broadcast %186 : vector<1x32xf32> to vector<8x32xf32>
    %206 = arith.addf %204, %205 : vector<8x32xf32>
    %c1 = arith.constant 1 : index
    %c0_90 = arith.constant 0 : index
    %c0_91 = arith.constant 0 : index
    %207 = vector.load %arg5[%c1, %c0_90, %c0_91] : memref<2x32x96xf32, #tpu.memory_space<vmem>>, vector<1x32x96xf32>
    %208 = vector.shape_cast %207 : vector<1x32x96xf32> to vector<32x96xf32>
    %cst_92 = arith.constant dense<0.000000e+00> : vector<8x96xf32>
    %209 = tpu.matmul %206, %208, %cst_92 {dimension_numbers = #tpu.dot_dimension_numbers<[1], [0], [0], [1], [0, 0, 1, 1], [], []>} : vector<8x32xf32>, vector<32x96xf32>, vector<8x96xf32> -> vector<8x96xf32>
    %c1_93 = arith.constant 1 : index
    %c0_94 = arith.constant 0 : index
    %c0_95 = arith.constant 0 : index
    %210 = vector.load %arg6[%c1_93, %c0_94, %c0_95] : memref<2x1x96xf32, #tpu.memory_space<vmem>>, vector<1x1x96xf32>
    %211 = vector.shape_cast %210 : vector<1x1x96xf32> to vector<1x96xf32>
    %212 = vector.broadcast %211 : vector<1x96xf32> to vector<8x96xf32>
    %213 = arith.addf %209, %212 : vector<8x96xf32>
    %c1_96 = arith.constant 1 : index
    %c0_97 = arith.constant 0 : index
    %c0_98 = arith.constant 0 : index
    %214 = vector.load %arg7[%c1_96, %c0_97, %c0_98] : memref<2x32x32xf32, #tpu.memory_space<vmem>>, vector<1x32x32xf32>
    %215 = vector.shape_cast %214 : vector<1x32x32xf32> to vector<32x32xf32>
    %216 = vector.extract_strided_slice %213 {offsets = [0, 0], sizes = [8, 8], strides = [1, 1]} : vector<8x96xf32> to vector<8x8xf32>
    %217 = vector.extract_strided_slice %213 {offsets = [0, 32], sizes = [8, 8], strides = [1, 1]} : vector<8x96xf32> to vector<8x8xf32>
    %218 = vector.extract_strided_slice %213 {offsets = [0, 64], sizes = [8, 8], strides = [1, 1]} : vector<8x96xf32> to vector<8x8xf32>
    %219 = tpu.transpose %217, [1, 0] : vector<8x8xf32> -> vector<8x8xf32>
    %cst_99 = arith.constant dense<0.000000e+00> : vector<8x8xf32>
    %220 = tpu.matmul %216, %219, %cst_99 {dimension_numbers = #tpu.dot_dimension_numbers<[1], [0], [0], [1], [0, 0, 1, 1], [], []>} : vector<8x8xf32>, vector<8x8xf32>, vector<8x8xf32> -> vector<8x8xf32>
    %cst_100 = arith.constant 0.353553385 : f32
    %221 = vector.broadcast %cst_100 : f32 to vector<8x8xf32>
    %222 = arith.mulf %220, %221 : vector<8x8xf32>
    %223 = vector.broadcast %25 : vector<1x8xf32> to vector<8x8xf32>
    %224 = arith.addf %222, %223 : vector<8x8xf32>
    %cst_101 = arith.constant dense<0xFF800000> : vector<8xf32>
    %225 = vector.multi_reduction <maximumf>, %224, %cst_101 [1] : vector<8x8xf32> to vector<8xf32>
    %226 = vector.shape_cast %225 : vector<8xf32> to vector<8x1xf32>
    %227 = vector.broadcast %226 : vector<8x1xf32> to vector<8x8xf32>
    %228 = arith.subf %224, %227 : vector<8x8xf32>
    %229 = math.exp %228 : vector<8x8xf32>
    %cst_102 = arith.constant dense<0.000000e+00> : vector<8xf32>
    %230 = vector.multi_reduction <add>, %229, %cst_102 [1] : vector<8x8xf32> to vector<8xf32>
    %231 = vector.shape_cast %230 : vector<8xf32> to vector<8x1xf32>
    %232 = tpu.reciprocal %231 {approx = true} : vector<8x1xf32> -> vector<8x1xf32>
    %233 = vector.broadcast %232 : vector<8x1xf32> to vector<8x8xf32>
    %234 = arith.mulf %229, %233 : vector<8x8xf32>
    %cst_103 = arith.constant dense<0.000000e+00> : vector<8x8xf32>
    %235 = tpu.matmul %234, %218, %cst_103 {dimension_numbers = #tpu.dot_dimension_numbers<[1], [0], [0], [1], [0, 0, 1, 1], [], []>} : vector<8x8xf32>, vector<8x8xf32>, vector<8x8xf32> -> vector<8x8xf32>
    %236 = vector.extract_strided_slice %215 {offsets = [0, 0], sizes = [8, 32], strides = [1, 1]} : vector<32x32xf32> to vector<8x32xf32>
    %cst_104 = arith.constant dense<0.000000e+00> : vector<8x32xf32>
    %237 = tpu.matmul %235, %236, %cst_104 {dimension_numbers = #tpu.dot_dimension_numbers<[1], [0], [0], [1], [0, 0, 1, 1], [], []>} : vector<8x8xf32>, vector<8x32xf32>, vector<8x32xf32> -> vector<8x32xf32>
    %238 = vector.extract_strided_slice %213 {offsets = [0, 8], sizes = [8, 8], strides = [1, 1]} : vector<8x96xf32> to vector<8x8xf32>
    %239 = vector.extract_strided_slice %213 {offsets = [0, 40], sizes = [8, 8], strides = [1, 1]} : vector<8x96xf32> to vector<8x8xf32>
    %240 = vector.extract_strided_slice %213 {offsets = [0, 72], sizes = [8, 8], strides = [1, 1]} : vector<8x96xf32> to vector<8x8xf32>
    %241 = tpu.transpose %239, [1, 0] : vector<8x8xf32> -> vector<8x8xf32>
    %cst_105 = arith.constant dense<0.000000e+00> : vector<8x8xf32>
    %242 = tpu.matmul %238, %241, %cst_105 {dimension_numbers = #tpu.dot_dimension_numbers<[1], [0], [0], [1], [0, 0, 1, 1], [], []>} : vector<8x8xf32>, vector<8x8xf32>, vector<8x8xf32> -> vector<8x8xf32>
    %cst_106 = arith.constant 0.353553385 : f32
    %243 = vector.broadcast %cst_106 : f32 to vector<8x8xf32>
    %244 = arith.mulf %242, %243 : vector<8x8xf32>
    %245 = vector.broadcast %25 : vector<1x8xf32> to vector<8x8xf32>
    %246 = arith.addf %244, %245 : vector<8x8xf32>
    %cst_107 = arith.constant dense<0xFF800000> : vector<8xf32>
    %247 = vector.multi_reduction <maximumf>, %246, %cst_107 [1] : vector<8x8xf32> to vector<8xf32>
    %248 = vector.shape_cast %247 : vector<8xf32> to vector<8x1xf32>
    %249 = vector.broadcast %248 : vector<8x1xf32> to vector<8x8xf32>
    %250 = arith.subf %246, %249 : vector<8x8xf32>
    %251 = math.exp %250 : vector<8x8xf32>
    %cst_108 = arith.constant dense<0.000000e+00> : vector<8xf32>
    %252 = vector.multi_reduction <add>, %251, %cst_108 [1] : vector<8x8xf32> to vector<8xf32>
    %253 = vector.shape_cast %252 : vector<8xf32> to vector<8x1xf32>
    %254 = tpu.reciprocal %253 {approx = true} : vector<8x1xf32> -> vector<8x1xf32>
    %255 = vector.broadcast %254 : vector<8x1xf32> to vector<8x8xf32>
    %256 = arith.mulf %251, %255 : vector<8x8xf32>
    %cst_109 = arith.constant dense<0.000000e+00> : vector<8x8xf32>
    %257 = tpu.matmul %256, %240, %cst_109 {dimension_numbers = #tpu.dot_dimension_numbers<[1], [0], [0], [1], [0, 0, 1, 1], [], []>} : vector<8x8xf32>, vector<8x8xf32>, vector<8x8xf32> -> vector<8x8xf32>
    %258 = vector.extract_strided_slice %215 {offsets = [8, 0], sizes = [8, 32], strides = [1, 1]} : vector<32x32xf32> to vector<8x32xf32>
    %cst_110 = arith.constant dense<0.000000e+00> : vector<8x32xf32>
    %259 = tpu.matmul %257, %258, %cst_110 {dimension_numbers = #tpu.dot_dimension_numbers<[1], [0], [0], [1], [0, 0, 1, 1], [], []>} : vector<8x8xf32>, vector<8x32xf32>, vector<8x32xf32> -> vector<8x32xf32>
    %260 = arith.addf %237, %259 : vector<8x32xf32>
    %261 = vector.extract_strided_slice %213 {offsets = [0, 16], sizes = [8, 8], strides = [1, 1]} : vector<8x96xf32> to vector<8x8xf32>
    %262 = vector.extract_strided_slice %213 {offsets = [0, 48], sizes = [8, 8], strides = [1, 1]} : vector<8x96xf32> to vector<8x8xf32>
    %263 = vector.extract_strided_slice %213 {offsets = [0, 80], sizes = [8, 8], strides = [1, 1]} : vector<8x96xf32> to vector<8x8xf32>
    %264 = tpu.transpose %262, [1, 0] : vector<8x8xf32> -> vector<8x8xf32>
    %cst_111 = arith.constant dense<0.000000e+00> : vector<8x8xf32>
    %265 = tpu.matmul %261, %264, %cst_111 {dimension_numbers = #tpu.dot_dimension_numbers<[1], [0], [0], [1], [0, 0, 1, 1], [], []>} : vector<8x8xf32>, vector<8x8xf32>, vector<8x8xf32> -> vector<8x8xf32>
    %cst_112 = arith.constant 0.353553385 : f32
    %266 = vector.broadcast %cst_112 : f32 to vector<8x8xf32>
    %267 = arith.mulf %265, %266 : vector<8x8xf32>
    %268 = vector.broadcast %25 : vector<1x8xf32> to vector<8x8xf32>
    %269 = arith.addf %267, %268 : vector<8x8xf32>
    %cst_113 = arith.constant dense<0xFF800000> : vector<8xf32>
    %270 = vector.multi_reduction <maximumf>, %269, %cst_113 [1] : vector<8x8xf32> to vector<8xf32>
    %271 = vector.shape_cast %270 : vector<8xf32> to vector<8x1xf32>
    %272 = vector.broadcast %271 : vector<8x1xf32> to vector<8x8xf32>
    %273 = arith.subf %269, %272 : vector<8x8xf32>
    %274 = math.exp %273 : vector<8x8xf32>
    %cst_114 = arith.constant dense<0.000000e+00> : vector<8xf32>
    %275 = vector.multi_reduction <add>, %274, %cst_114 [1] : vector<8x8xf32> to vector<8xf32>
    %276 = vector.shape_cast %275 : vector<8xf32> to vector<8x1xf32>
    %277 = tpu.reciprocal %276 {approx = true} : vector<8x1xf32> -> vector<8x1xf32>
    %278 = vector.broadcast %277 : vector<8x1xf32> to vector<8x8xf32>
    %279 = arith.mulf %274, %278 : vector<8x8xf32>
    %cst_115 = arith.constant dense<0.000000e+00> : vector<8x8xf32>
    %280 = tpu.matmul %279, %263, %cst_115 {dimension_numbers = #tpu.dot_dimension_numbers<[1], [0], [0], [1], [0, 0, 1, 1], [], []>} : vector<8x8xf32>, vector<8x8xf32>, vector<8x8xf32> -> vector<8x8xf32>
    %281 = vector.extract_strided_slice %215 {offsets = [16, 0], sizes = [8, 32], strides = [1, 1]} : vector<32x32xf32> to vector<8x32xf32>
    %cst_116 = arith.constant dense<0.000000e+00> : vector<8x32xf32>
    %282 = tpu.matmul %280, %281, %cst_116 {dimension_numbers = #tpu.dot_dimension_numbers<[1], [0], [0], [1], [0, 0, 1, 1], [], []>} : vector<8x8xf32>, vector<8x32xf32>, vector<8x32xf32> -> vector<8x32xf32>
    %283 = arith.addf %260, %282 : vector<8x32xf32>
    %284 = vector.extract_strided_slice %213 {offsets = [0, 24], sizes = [8, 8], strides = [1, 1]} : vector<8x96xf32> to vector<8x8xf32>
    %285 = vector.extract_strided_slice %213 {offsets = [0, 56], sizes = [8, 8], strides = [1, 1]} : vector<8x96xf32> to vector<8x8xf32>
    %286 = vector.extract_strided_slice %213 {offsets = [0, 88], sizes = [8, 8], strides = [1, 1]} : vector<8x96xf32> to vector<8x8xf32>
    %287 = tpu.transpose %285, [1, 0] : vector<8x8xf32> -> vector<8x8xf32>
    %cst_117 = arith.constant dense<0.000000e+00> : vector<8x8xf32>
    %288 = tpu.matmul %284, %287, %cst_117 {dimension_numbers = #tpu.dot_dimension_numbers<[1], [0], [0], [1], [0, 0, 1, 1], [], []>} : vector<8x8xf32>, vector<8x8xf32>, vector<8x8xf32> -> vector<8x8xf32>
    %cst_118 = arith.constant 0.353553385 : f32
    %289 = vector.broadcast %cst_118 : f32 to vector<8x8xf32>
    %290 = arith.mulf %288, %289 : vector<8x8xf32>
    %291 = vector.broadcast %25 : vector<1x8xf32> to vector<8x8xf32>
    %292 = arith.addf %290, %291 : vector<8x8xf32>
    %cst_119 = arith.constant dense<0xFF800000> : vector<8xf32>
    %293 = vector.multi_reduction <maximumf>, %292, %cst_119 [1] : vector<8x8xf32> to vector<8xf32>
    %294 = vector.shape_cast %293 : vector<8xf32> to vector<8x1xf32>
    %295 = vector.broadcast %294 : vector<8x1xf32> to vector<8x8xf32>
    %296 = arith.subf %292, %295 : vector<8x8xf32>
    %297 = math.exp %296 : vector<8x8xf32>
    %cst_120 = arith.constant dense<0.000000e+00> : vector<8xf32>
    %298 = vector.multi_reduction <add>, %297, %cst_120 [1] : vector<8x8xf32> to vector<8xf32>
    %299 = vector.shape_cast %298 : vector<8xf32> to vector<8x1xf32>
    %300 = tpu.reciprocal %299 {approx = true} : vector<8x1xf32> -> vector<8x1xf32>
    %301 = vector.broadcast %300 : vector<8x1xf32> to vector<8x8xf32>
    %302 = arith.mulf %297, %301 : vector<8x8xf32>
    %cst_121 = arith.constant dense<0.000000e+00> : vector<8x8xf32>
    %303 = tpu.matmul %302, %286, %cst_121 {dimension_numbers = #tpu.dot_dimension_numbers<[1], [0], [0], [1], [0, 0, 1, 1], [], []>} : vector<8x8xf32>, vector<8x8xf32>, vector<8x8xf32> -> vector<8x8xf32>
    %304 = vector.extract_strided_slice %215 {offsets = [24, 0], sizes = [8, 32], strides = [1, 1]} : vector<32x32xf32> to vector<8x32xf32>
    %cst_122 = arith.constant dense<0.000000e+00> : vector<8x32xf32>
    %305 = tpu.matmul %303, %304, %cst_122 {dimension_numbers = #tpu.dot_dimension_numbers<[1], [0], [0], [1], [0, 0, 1, 1], [], []>} : vector<8x8xf32>, vector<8x32xf32>, vector<8x32xf32> -> vector<8x32xf32>
    %306 = arith.addf %283, %305 : vector<8x32xf32>
    %c1_123 = arith.constant 1 : index
    %c0_124 = arith.constant 0 : index
    %c0_125 = arith.constant 0 : index
    %307 = vector.load %arg8[%c1_123, %c0_124, %c0_125] : memref<2x1x32xf32, #tpu.memory_space<vmem>>, vector<1x1x32xf32>
    %308 = vector.shape_cast %307 : vector<1x1x32xf32> to vector<1x32xf32>
    %309 = vector.broadcast %308 : vector<1x32xf32> to vector<8x32xf32>
    %310 = arith.addf %306, %309 : vector<8x32xf32>
    %311 = arith.addf %310, %206 : vector<8x32xf32>
    %c1_126 = arith.constant 1 : index
    %c0_127 = arith.constant 0 : index
    %c0_128 = arith.constant 0 : index
    %312 = vector.load %arg9[%c1_126, %c0_127, %c0_128] : memref<2x1x32xf32, #tpu.memory_space<vmem>>, vector<1x1x32xf32>
    %313 = vector.shape_cast %312 : vector<1x1x32xf32> to vector<1x32xf32>
    %c1_129 = arith.constant 1 : index
    %c0_130 = arith.constant 0 : index
    %c0_131 = arith.constant 0 : index
    %314 = vector.load %arg10[%c1_129, %c0_130, %c0_131] : memref<2x1x32xf32, #tpu.memory_space<vmem>>, vector<1x1x32xf32>
    %315 = vector.shape_cast %314 : vector<1x1x32xf32> to vector<1x32xf32>
    %cst_132 = arith.constant dense<0.000000e+00> : vector<8xf32>
    %316 = vector.multi_reduction <add>, %311, %cst_132 [1] : vector<8x32xf32> to vector<8xf32>
    %317 = vector.shape_cast %316 : vector<8xf32> to vector<8x1xf32>
    %cst_133 = arith.constant 3.200000e+01 : f32
    %318 = vector.broadcast %cst_133 : f32 to vector<8x1xf32>
    %319 = arith.divf %317, %318 : vector<8x1xf32>
    %320 = vector.broadcast %319 : vector<8x1xf32> to vector<8x32xf32>
    %321 = arith.subf %311, %320 : vector<8x32xf32>
    %322 = arith.mulf %321, %321 : vector<8x32xf32>
    %cst_134 = arith.constant dense<0.000000e+00> : vector<8xf32>
    %323 = vector.multi_reduction <add>, %322, %cst_134 [1] : vector<8x32xf32> to vector<8xf32>
    %324 = vector.shape_cast %323 : vector<8xf32> to vector<8x1xf32>
    %cst_135 = arith.constant 3.200000e+01 : f32
    %325 = vector.broadcast %cst_135 : f32 to vector<8x1xf32>
    %326 = arith.divf %324, %325 : vector<8x1xf32>
    %cst_136 = arith.constant 9.99999996E-13 : f32
    %327 = vector.broadcast %cst_136 : f32 to vector<8x1xf32>
    %328 = arith.addf %326, %327 : vector<8x1xf32>
    %329 = math.rsqrt %328 : vector<8x1xf32>
    %330 = vector.broadcast %329 : vector<8x1xf32> to vector<8x32xf32>
    %331 = arith.mulf %321, %330 : vector<8x32xf32>
    %332 = vector.broadcast %313 : vector<1x32xf32> to vector<8x32xf32>
    %333 = arith.mulf %331, %332 : vector<8x32xf32>
    %334 = vector.broadcast %315 : vector<1x32xf32> to vector<8x32xf32>
    %335 = arith.addf %333, %334 : vector<8x32xf32>
    %c1_137 = arith.constant 1 : index
    %c0_138 = arith.constant 0 : index
    %c0_139 = arith.constant 0 : index
    %336 = vector.load %arg11[%c1_137, %c0_138, %c0_139] : memref<2x32x64xf32, #tpu.memory_space<vmem>>, vector<1x32x64xf32>
    %337 = vector.shape_cast %336 : vector<1x32x64xf32> to vector<32x64xf32>
    %cst_140 = arith.constant dense<0.000000e+00> : vector<8x64xf32>
    %338 = tpu.matmul %335, %337, %cst_140 {dimension_numbers = #tpu.dot_dimension_numbers<[1], [0], [0], [1], [0, 0, 1, 1], [], []>} : vector<8x32xf32>, vector<32x64xf32>, vector<8x64xf32> -> vector<8x64xf32>
    %c1_141 = arith.constant 1 : index
    %c0_142 = arith.constant 0 : index
    %c0_143 = arith.constant 0 : index
    %339 = vector.load %arg12[%c1_141, %c0_142, %c0_143] : memref<2x1x64xf32, #tpu.memory_space<vmem>>, vector<1x1x64xf32>
    %340 = vector.shape_cast %339 : vector<1x1x64xf32> to vector<1x64xf32>
    %341 = vector.broadcast %340 : vector<1x64xf32> to vector<8x64xf32>
    %342 = arith.addf %338, %341 : vector<8x64xf32>
    %cst_144 = arith.constant 5.000000e-01 : f32
    %343 = vector.broadcast %cst_144 : f32 to vector<8x64xf32>
    %344 = arith.mulf %343, %342 : vector<8x64xf32>
    %cst_145 = arith.constant 4.471500e-02 : f32
    %345 = vector.broadcast %cst_145 : f32 to vector<8x64xf32>
    %346 = arith.mulf %345, %342 : vector<8x64xf32>
    %347 = arith.mulf %346, %342 : vector<8x64xf32>
    %348 = arith.mulf %347, %342 : vector<8x64xf32>
    %349 = arith.addf %342, %348 : vector<8x64xf32>
    %cst_146 = arith.constant 0.797884583 : f32
    %350 = vector.broadcast %cst_146 : f32 to vector<8x64xf32>
    %351 = arith.mulf %350, %349 : vector<8x64xf32>
    %352 = math.tanh %351 : vector<8x64xf32>
    %cst_147 = arith.constant 1.000000e+00 : f32
    %353 = vector.broadcast %cst_147 : f32 to vector<8x64xf32>
    %354 = arith.addf %353, %352 : vector<8x64xf32>
    %355 = arith.mulf %344, %354 : vector<8x64xf32>
    %c1_148 = arith.constant 1 : index
    %c0_149 = arith.constant 0 : index
    %c0_150 = arith.constant 0 : index
    %356 = vector.load %arg13[%c1_148, %c0_149, %c0_150] : memref<2x64x32xf32, #tpu.memory_space<vmem>>, vector<1x64x32xf32>
    %357 = vector.shape_cast %356 : vector<1x64x32xf32> to vector<64x32xf32>
    %cst_151 = arith.constant dense<0.000000e+00> : vector<8x32xf32>
    %358 = tpu.matmul %355, %357, %cst_151 {dimension_numbers = #tpu.dot_dimension_numbers<[1], [0], [0], [1], [0, 0, 1, 1], [], []>} : vector<8x64xf32>, vector<64x32xf32>, vector<8x32xf32> -> vector<8x32xf32>
    %c1_152 = arith.constant 1 : index
    %c0_153 = arith.constant 0 : index
    %c0_154 = arith.constant 0 : index
    %359 = vector.load %arg14[%c1_152, %c0_153, %c0_154] : memref<2x1x32xf32, #tpu.memory_space<vmem>>, vector<1x1x32xf32>
    %360 = vector.shape_cast %359 : vector<1x1x32xf32> to vector<1x32xf32>
    %361 = vector.broadcast %360 : vector<1x32xf32> to vector<8x32xf32>
    %362 = arith.addf %358, %361 : vector<8x32xf32>
    %363 = arith.addf %362, %335 : vector<8x32xf32>
    %c1_155 = arith.constant 1 : index
    %c0_156 = arith.constant 0 : index
    %c0_157 = arith.constant 0 : index
    %364 = vector.load %arg15[%c1_155, %c0_156, %c0_157] : memref<2x1x32xf32, #tpu.memory_space<vmem>>, vector<1x1x32xf32>
    %365 = vector.shape_cast %364 : vector<1x1x32xf32> to vector<1x32xf32>
    %c1_158 = arith.constant 1 : index
    %c0_159 = arith.constant 0 : index
    %c0_160 = arith.constant 0 : index
    %366 = vector.load %arg16[%c1_158, %c0_159, %c0_160] : memref<2x1x32xf32, #tpu.memory_space<vmem>>, vector<1x1x32xf32>
    %367 = vector.shape_cast %366 : vector<1x1x32xf32> to vector<1x32xf32>
    %cst_161 = arith.constant dense<0.000000e+00> : vector<8xf32>
    %368 = vector.multi_reduction <add>, %363, %cst_161 [1] : vector<8x32xf32> to vector<8xf32>
    %369 = vector.shape_cast %368 : vector<8xf32> to vector<8x1xf32>
    %cst_162 = arith.constant 3.200000e+01 : f32
    %370 = vector.broadcast %cst_162 : f32 to vector<8x1xf32>
    %371 = arith.divf %369, %370 : vector<8x1xf32>
    %372 = vector.broadcast %371 : vector<8x1xf32> to vector<8x32xf32>
    %373 = arith.subf %363, %372 : vector<8x32xf32>
    %374 = arith.mulf %373, %373 : vector<8x32xf32>
    %cst_163 = arith.constant dense<0.000000e+00> : vector<8xf32>
    %375 = vector.multi_reduction <add>, %374, %cst_163 [1] : vector<8x32xf32> to vector<8xf32>
    %376 = vector.shape_cast %375 : vector<8xf32> to vector<8x1xf32>
    %cst_164 = arith.constant 3.200000e+01 : f32
    %377 = vector.broadcast %cst_164 : f32 to vector<8x1xf32>
    %378 = arith.divf %376, %377 : vector<8x1xf32>
    %cst_165 = arith.constant 9.99999996E-13 : f32
    %379 = vector.broadcast %cst_165 : f32 to vector<8x1xf32>
    %380 = arith.addf %378, %379 : vector<8x1xf32>
    %381 = math.rsqrt %380 : vector<8x1xf32>
    %382 = vector.broadcast %381 : vector<8x1xf32> to vector<8x32xf32>
    %383 = arith.mulf %373, %382 : vector<8x32xf32>
    %384 = vector.broadcast %365 : vector<1x32xf32> to vector<8x32xf32>
    %385 = arith.mulf %383, %384 : vector<8x32xf32>
    %386 = vector.broadcast %367 : vector<1x32xf32> to vector<8x32xf32>
    %387 = arith.addf %385, %386 : vector<8x32xf32>
    %cst_166 = arith.constant dense<0.000000e+00> : vector<32xf32>
    %388 = vector.multi_reduction <add>, %387, %cst_166 [0] : vector<8x32xf32> to vector<32xf32>
    %389 = vector.shape_cast %388 : vector<32xf32> to vector<1x32xf32>
    %cst_167 = arith.constant 8.000000e+00 : f32
    %390 = vector.broadcast %cst_167 : f32 to vector<1x32xf32>
    %391 = arith.divf %389, %390 : vector<1x32xf32>
    %c0_168 = arith.constant 0 : index
    %c0_169 = arith.constant 0 : index
    %c0_170 = arith.constant 0 : index
    %392 = vector.load %arg21[%c0_168, %c0_169, %c0_170] : memref<1x1x32xf32, #tpu.memory_space<vmem>>, vector<1x1x32xf32>
    %393 = vector.shape_cast %392 : vector<1x1x32xf32> to vector<1x32xf32>
    %394 = vector.shape_cast %391 : vector<1x32xf32> to vector<1x1x32xf32>
    tpu.vector_store %arg21[%c0_168, %c0_169, %c0_170], %394 {strides = array<i32>} : memref<1x1x32xf32, #tpu.memory_space<vmem>>, vector<1x1x32xf32>,
    %c0_171 = arith.constant 0 : index
    %c0_172 = arith.constant 0 : index
    %395 = vector.load %arg17[%c0_171, %c0_172] : memref<32x32xf32, #tpu.memory_space<vmem>>, vector<32x32xf32>
    %cst_173 = arith.constant dense<0.000000e+00> : vector<1x32xf32>
    %396 = tpu.matmul %391, %395, %cst_173 {dimension_numbers = #tpu.dot_dimension_numbers<[1], [0], [0], [1], [0, 0, 1, 1], [], []>} : vector<1x32xf32>, vector<32x32xf32>, vector<1x32xf32> -> vector<1x32xf32>
    %c0_174 = arith.constant 0 : index
    %c0_175 = arith.constant 0 : index
    %397 = vector.load %arg18[%c0_174, %c0_175] : memref<1x32xf32, #tpu.memory_space<vmem>>, vector<1x32xf32>
    %398 = arith.addf %396, %397 : vector<1x32xf32>
    %cst_176 = arith.constant 0.000000e+00 : f32
    %399 = vector.broadcast %cst_176 : f32 to vector<1x32xf32>
    %400 = arith.maximumf %398, %399 : vector<1x32xf32>
    %c0_177 = arith.constant 0 : index
    %c0_178 = arith.constant 0 : index
    %401 = vector.load %arg19[%c0_177, %c0_178] : memref<32x2xf32, #tpu.memory_space<vmem>>, vector<32x2xf32>
    %cst_179 = arith.constant dense<0.000000e+00> : vector<1x2xf32>
    %402 = tpu.matmul %400, %401, %cst_179 {dimension_numbers = #tpu.dot_dimension_numbers<[1], [0], [0], [1], [0, 0, 1, 1], [], []>} : vector<1x32xf32>, vector<32x2xf32>, vector<1x2xf32> -> vector<1x2xf32>
    %c0_180 = arith.constant 0 : index
    %c0_181 = arith.constant 0 : index
    %403 = vector.load %arg20[%c0_180, %c0_181] : memref<1x2xf32, #tpu.memory_space<vmem>>, vector<1x2xf32>
    %404 = arith.addf %402, %403 : vector<1x2xf32>
    %c0_182 = arith.constant 0 : index
    %c0_183 = arith.constant 0 : index
    %c0_184 = arith.constant 0 : index
    %405 = vector.load %arg22[%c0_182, %c0_183, %c0_184] : memref<1x1x2xf32, #tpu.memory_space<vmem>>, vector<1x1x2xf32>
    %406 = vector.shape_cast %405 : vector<1x1x2xf32> to vector<1x2xf32>
    %407 = vector.shape_cast %404 : vector<1x2xf32> to vector<1x1x2xf32>
    tpu.vector_store %arg22[%c0_182, %c0_183, %c0_184], %407 {strides = array<i32>} : memref<1x1x2xf32, #tpu.memory_space<vmem>>, vector<1x1x2xf32>,
    return
  }
  func.func @transform_0(%arg0: i32) -> (i32, i32, i32) {
    %c0_i32 = arith.constant 0 : i32
    %c0_i32_0 = arith.constant 0 : i32
    %c0_i32_1 = arith.constant 0 : i32
    return %arg0, %c0_i32, %c0_i32_0 : i32, i32, i32
  }
  func.func @transform_1(%arg0: i32) -> (i32, i32, i32) {
    %c0_i32 = arith.constant 0 : i32
    %c0_i32_0 = arith.constant 0 : i32
    %c0_i32_1 = arith.constant 0 : i32
    return %arg0, %c0_i32, %c0_i32_0 : i32, i32, i32
  }
  func.func @transform_2(%arg0: i32) -> (i32, i32) {
    %c0_i32 = arith.constant 0 : i32
    %c0_i32_0 = arith.constant 0 : i32
    %c0_i32_1 = arith.constant 0 : i32
    return %c0_i32, %c0_i32_0 : i32, i32
  }
  func.func @transform_3(%arg0: i32) -> (i32, i32) {
    %c0_i32 = arith.constant 0 : i32
    %c0_i32_0 = arith.constant 0 : i32
    %c0_i32_1 = arith.constant 0 : i32
    return %c0_i32, %c0_i32_0 : i32, i32
  }
  func.func @transform_4(%arg0: i32) -> (i32, i32, i32) {
    %c0_i32 = arith.constant 0 : i32
    %c0_i32_0 = arith.constant 0 : i32
    %c0_i32_1 = arith.constant 0 : i32
    %c0_i32_2 = arith.constant 0 : i32
    return %c0_i32, %c0_i32_0, %c0_i32_1 : i32, i32, i32
  }
  func.func @transform_5(%arg0: i32) -> (i32, i32, i32) {
    %c0_i32 = arith.constant 0 : i32
    %c0_i32_0 = arith.constant 0 : i32
    %c0_i32_1 = arith.constant 0 : i32
    %c0_i32_2 = arith.constant 0 : i32
    return %c0_i32, %c0_i32_0, %c0_i32_1 : i32, i32, i32
  }
  func.func @transform_6(%arg0: i32) -> (i32, i32, i32) {
    %c0_i32 = arith.constant 0 : i32
    %c0_i32_0 = arith.constant 0 : i32
    %c0_i32_1 = arith.constant 0 : i32
    %c0_i32_2 = arith.constant 0 : i32
    return %c0_i32, %c0_i32_0, %c0_i32_1 : i32, i32, i32
  }
  func.func @transform_7(%arg0: i32) -> (i32, i32, i32) {
    %c0_i32 = arith.constant 0 : i32
    %c0_i32_0 = arith.constant 0 : i32
    %c0_i32_1 = arith.constant 0 : i32
    %c0_i32_2 = arith.constant 0 : i32
    return %c0_i32, %c0_i32_0, %c0_i32_1 : i32, i32, i32
  }
  func.func @transform_8(%arg0: i32) -> (i32, i32, i32) {
    %c0_i32 = arith.constant 0 : i32
    %c0_i32_0 = arith.constant 0 : i32
    %c0_i32_1 = arith.constant 0 : i32
    %c0_i32_2 = arith.constant 0 : i32
    return %c0_i32, %c0_i32_0, %c0_i32_1 : i32, i32, i32
  }
  func.func @transform_9(%arg0: i32) -> (i32, i32, i32) {
    %c0_i32 = arith.constant 0 : i32
    %c0_i32_0 = arith.constant 0 : i32
    %c0_i32_1 = arith.constant 0 : i32
    %c0_i32_2 = arith.constant 0 : i32
    return %c0_i32, %c0_i32_0, %c0_i32_1 : i32, i32, i32
  }
  func.func @transform_10(%arg0: i32) -> (i32, i32, i32) {
    %c0_i32 = arith.constant 0 : i32
    %c0_i32_0 = arith.constant 0 : i32
    %c0_i32_1 = arith.constant 0 : i32
    %c0_i32_2 = arith.constant 0 : i32
    return %c0_i32, %c0_i32_0, %c0_i32_1 : i32, i32, i32
  }
  func.func @transform_11(%arg0: i32) -> (i32, i32, i32) {
    %c0_i32 = arith.constant 0 : i32
    %c0_i32_0 = arith.constant 0 : i32
    %c0_i32_1 = arith.constant 0 : i32
    %c0_i32_2 = arith.constant 0 : i32
    return %c0_i32, %c0_i32_0, %c0_i32_1 : i32, i32, i32
  }
  func.func @transform_12(%arg0: i32) -> (i32, i32, i32) {
    %c0_i32 = arith.constant 0 : i32
    %c0_i32_0 = arith.constant 0 : i32
    %c0_i32_1 = arith.constant 0 : i32
    %c0_i32_2 = arith.constant 0 : i32
    return %c0_i32, %c0_i32_0, %c0_i32_1 : i32, i32, i32
  }
  func.func @transform_13(%arg0: i32) -> (i32, i32, i32) {
    %c0_i32 = arith.constant 0 : i32
    %c0_i32_0 = arith.constant 0 : i32
    %c0_i32_1 = arith.constant 0 : i32
    %c0_i32_2 = arith.constant 0 : i32
    return %c0_i32, %c0_i32_0, %c0_i32_1 : i32, i32, i32
  }
  func.func @transform_14(%arg0: i32) -> (i32, i32, i32) {
    %c0_i32 = arith.constant 0 : i32
    %c0_i32_0 = arith.constant 0 : i32
    %c0_i32_1 = arith.constant 0 : i32
    %c0_i32_2 = arith.constant 0 : i32
    return %c0_i32, %c0_i32_0, %c0_i32_1 : i32, i32, i32
  }
  func.func @transform_15(%arg0: i32) -> (i32, i32, i32) {
    %c0_i32 = arith.constant 0 : i32
    %c0_i32_0 = arith.constant 0 : i32
    %c0_i32_1 = arith.constant 0 : i32
    %c0_i32_2 = arith.constant 0 : i32
    return %c0_i32, %c0_i32_0, %c0_i32_1 : i32, i32, i32
  }
  func.func @transform_16(%arg0: i32) -> (i32, i32) {
    %c0_i32 = arith.constant 0 : i32
    %c0_i32_0 = arith.constant 0 : i32
    %c0_i32_1 = arith.constant 0 : i32
    return %c0_i32, %c0_i32_0 : i32, i32
  }
  func.func @transform_17(%arg0: i32) -> (i32, i32) {
    %c0_i32 = arith.constant 0 : i32
    %c0_i32_0 = arith.constant 0 : i32
    %c0_i32_1 = arith.constant 0 : i32
    return %c0_i32, %c0_i32_0 : i32, i32
  }
  func.func @transform_18(%arg0: i32) -> (i32, i32) {
    %c0_i32 = arith.constant 0 : i32
    %c0_i32_0 = arith.constant 0 : i32
    %c0_i32_1 = arith.constant 0 : i32
    return %c0_i32, %c0_i32_0 : i32, i32
  }
  func.func @transform_19(%arg0: i32) -> (i32, i32) {
    %c0_i32 = arith.constant 0 : i32
    %c0_i32_0 = arith.constant 0 : i32
    %c0_i32_1 = arith.constant 0 : i32
    return %c0_i32, %c0_i32_0 : i32, i32
  }
  func.func @transform_20(%arg0: i32) -> (i32, i32, i32) {
    %c0_i32 = arith.constant 0 : i32
    %c0_i32_0 = arith.constant 0 : i32
    %c0_i32_1 = arith.constant 0 : i32
    return %arg0, %c0_i32, %c0_i32_0 : i32, i32, i32
  }
  func.func @transform_21(%arg0: i32) -> (i32, i32, i32) {
    %c0_i32 = arith.constant 0 : i32
    %c0_i32_0 = arith.constant 0 : i32
    %c0_i32_1 = arith.constant 0 : i32
    return %arg0, %c0_i32, %c0_i32_0 : i32, i32, i32
  }
}

</mosaic_0001>

<bundles_post_ra>
// kernel: lm_model_forward.1
= control target key start
LH: loop header
LB: loop body
LE: loop exit
PB: predicated region body
PF: predicated region fallthrough
CT: control target
= control target key end

     0   :  { %s4944_s0 = inlined_call_operand.vmem [shape: f32[2,8,32], index: 0, kind: input, shape index: {}]   ;;  %s4945_s1 = inlined_call_operand.vmem [shape: f32[2,1,8], index: 1, kind: input, shape index: {}]   ;;  %s4946_s2 = inlined_call_operand.vmem [shape: f32[1,32], index: 2, kind: input, shape index: {}]   ;;  %s4947_s3 = inlined_call_operand.vmem [shape: f32[1,32], index: 3, kind: input, shape index: {}]   ;;  %s4948_s4 = inlined_call_operand.vmem [shape: f32[2,32,96], index: 4, kind: input, shape index: {}]   ;;  %s4949_s5 = inlined_call_operand.vmem [shape: f32[2,1,96], index: 5, kind: input, shape index: {}]   ;;  %s4950_s6 = inlined_call_operand.vmem [shape: f32[2,32,32], index: 6, kind: input, shape index: {}]   ;;  %s4951_s7 = inlined_call_operand.vmem [shape: f32[2,1,32], index: 7, kind: input, shape index: {}]   ;;  %s4952_s8 = inlined_call_operand.vmem [shape: f32[2,1,32], index: 8, kind: input, shape index: {}]   ;;  %s4953_s9 = inlined_call_operand.vmem [shape: f32[2,1,32], index: 9, kind: input, shape index: {}]   ;;  %s4954_s10 = inlined_call_operand.vmem [shape: f32[2,32,64], index: 10, kind: input, shape index: {}]   ;;  %s4955_s11 = inlined_call_operand.vmem [shape: f32[2,1,64], index: 11, kind: input, shape index: {}]   ;;  %s4956_s12 = inlined_call_operand.vmem [shape: f32[2,64,32], index: 12, kind: input, shape index: {}]   ;;  %s4957_s13 = inlined_call_operand.vmem [shape: f32[2,1,32], index: 13, kind: input, shape index: {}]   ;;  %s4958_s14 = inlined_call_operand.vmem [shape: f32[2,1,32], index: 14, kind: input, shape index: {}]   ;;  %s4959_s15 = inlined_call_operand.vmem [shape: f32[2,1,32], index: 15, kind: input, shape index: {}]   ;;  %s4960_s16 = inlined_call_operand.vmem [shape: f32[32,32], index: 16, kind: input, shape index: {}]   ;;  %s4961_s17 = inlined_call_operand.vmem [shape: f32[1,32], index: 17, kind: input, shape index: {}]   ;;  %s4962_s18 = inlined_call_operand.vmem [shape: f32[32,2], index: 18, kind: input, shape index: {}]   ;;  %s4963_s19 = inlined_call_operand.vmem [shape: f32[1,2], index: 19, kind: input, shape index: {}]   ;;  %s4964_s20 = inlined_call_operand.hbm [shape: f32[2,1,32], index: 20, kind: output, shape index: {0}]   ;;  %s4965_s21 = inlined_call_operand.hbm [shape: f32[2,1,2], index: 21, kind: output, shape index: {1}]  }
   0x1   :  { %4984 = sst [smem:[#allocation13_spill]] %s4944_s0 }
   0x2   :  { %4985 = sst [smem:[#allocation14_spill]] %s4945_s1 }
   0x3   :  { %4986 = sst [smem:[#allocation15_spill]] %s4946_s2 }
   0x4   :  { %4987 = sst [smem:[#allocation16_spill]] %s4947_s3 }
   0x5   :  { %4988 = sst [smem:[#allocation17_spill]] %s4948_s4 }
   0x6   :  { %4989 = sst [smem:[#allocation18_spill]] %s4949_s5 }
   0x7   :  { %4990 = sst [smem:[#allocation19_spill]] %s4950_s6 }
   0x8   :  { %4991 = sst [smem:[#allocation20_spill]] %s4951_s7 }
   0x9   :  { %4992 = sst [smem:[#allocation21_spill]] %s4952_s8 }
   0xa   :  { %4993 = sst [smem:[#allocation22_spill]] %s4953_s9 }
   0xb   :  { %4994 = sst [smem:[#allocation23_spill]] %s4954_s10 }
   0xc   :  { %4995 = sst [smem:[#allocation24_spill]] %s4965_s21 }
   0xd   :  { %27 = vsyncpa [#allocation3], 0 }
   0xe   :  { %29 = vsyncpa [#allocation3 + $0x1], 0 }
   0xf   :  { %30 = vsyncpa [#allocation5], 0 }
  0x10   :  { %32 = vsyncpa [#allocation5 + $0x1], 0  ;;  %s4352_s2 = smov 0   ;;  %s4354_s25 = smov 0  }
  0x11   :  { %s4356_s26 = smov 0   ;;  %s4358_s27 = smov 0  }
  0x12 LB: > { %4996 = sst [smem:[#allocation8_spill]] %s4213_s2  ;;  %s4373_s3 = sadd.s32 4294967295, %s4225_s27   ;;  %s4225_s27 = sphi %s4358_s27, %s5029_s27   ;;  %s4221_s26 = sphi %s4356_s26, %s5031_s26   ;;  %s4217_s25 = sphi %s4354_s25, %s5033_s25   ;;  %s4213_s2 = sphi %s4352_s2, %s5032_s2  }
  0x13   : > { %4997 = sst [smem:[#allocation9_spill]] %s4221_s26  ;;  %s3616_s28 = sadd.s32 4294967294, %s4225_s27  }
  0x14   : > { %s4377_s29 = sadd.s32 1, %s4225_s27   ;;  %s475_s0 = sadd.s32 1, %s4221_s26 }
  0x15   : > { %4998 = sst [smem:[#allocation10_spill]] %s4377_s29  ;;  %s472_s4 = ssub.s32 %s4225_s27, %s4377_s29 }
  0x16   : > { %p485_p0 = scmp.ne.s32.totalorder %s4221_s26, %s4217_s25  ;;  %p473_p1 = scmp.eq.s32.totalorder %s472_s4, 0 }
  0x17   : > { %p486_p2 = scmp.eq.s32.totalorder %s4373_s3, 1  ;;  %p491_p3 = scmp.ne.s32.totalorder %s4217_s25, %s4213_s2 }
  0x18   : > { %p492_p4 = scmp.eq.s32.totalorder %s3616_s28, 1  ;;  %p3619_p7 = scmp.ge.s32.totalorder %s4225_s27, 1 }
  0x19   : > { %s4388_s30 = scalar_select %p473_p1, %s4221_s26, %s475_s0  }
  0x1a   : > { %p4390_p5 = por %p486_p2, %p485_p0  ;;  %p4394_p6 = por %p492_p4, %p491_p3 }
  0x1b   : > { %4999 = sst [smem:[#allocation11_spill]] %s4388_s30  ;;  %p603_p8 = scmp.lt.s32.totalorder %s4225_s27, 3 }
  0x1c   : > { %s5001_s22 = scalar_select %p4394_p6, 1, 0 }
  0x1d   : > { %p604_p9 = pnand %p3619_p7, %p603_p8 }
  0x1e   : > { %5002 = sst [smem:[#allocation12_spill]] %s5001_s22  ;;  %p668_p10 = scmp.lt.s32.totalorder (!%p604_p9), %s4373_s3, 1 }
  0x1f   : > { %607 = sbr.rel (%p604_p9) target bundleno = 8224 (0x2020), region = 100  ;;  %s5003_s0 = sld [smem:[#allocation13_spill]] (!%p604_p9) }
  0x20   : > { %s5004_s29 = sld [smem:[#allocation17_spill]] (!%p604_p9)  ;;  %s4230_s24 = smov (!%p604_p9), 96  }
  0x21   : > { %s5006_s26 = sld [smem:[#allocation16_spill]] (!%p604_p9)  ;;  %s4980_s30 = smov (!%p604_p9), 80  }
  0x22   : > { %s5007_s2 = sld [smem:[#allocation18_spill]] (!%p604_p9)  ;;  %s4979_s22 = smov (!%p604_p9), 48  }
  0x23   : > { %s5010_s6 = sld [smem:[#allocation19_spill]] (!%p604_p9) }
  0x24   : > { %s4402_s23 = scalar_select %p668_p10, %s4373_s3, 1  ;;  %vm678_vm0 = vcmask 261120   ;;  %v4227_v8 = vmov 0.0   ;;  %vm4228_vm1 = vmmov 0   ;;  %vm799_vm2 = vcmask 64512  }
  0x25   : > { %3808 = vmatprep.subr.mxu0 %v4227_v8  ;;  %3816 = vmatprep.mubr.msk.f32.mxu0 %vm4228_vm1, %v4227_v8  ;;  %s5011_s7 = sld [smem:[#allocation20_spill]]  ;;  %vm1910_vm3 = vcmask 523264   ;;  %vm3333_vm4 = vcmask 253952  }
  0x26   : > { %s3620_s1 = sshll.u32 %s4402_s23, 3  ;;  %v711_v7 = vld [vmem:[%s5004_s29 + $0x18] sm:$0xff]  ;;  %v710_v9 = vld [vmem:[%s5004_s29 + $0x10] sm:$0xff]  ;;  %3819 = vmatprep.subr.mxu1 %v4227_v8  ;;  %v709_v10 = vld [vmem:[%s5004_s29 + $0x8] sm:$0xff]  ;;  %3821 = vmatprep.mubr.msk.f32.mxu1 %vm4228_vm1, %v4227_v8  ;;  %s5012_s10 = sld [smem:[#allocation23_spill]] }
  0x27   : > { %s671_s4 = scalar_lea.vmem %s5003_s0, %s3620_s1  ;;  %3809 = vmatpush3.msra.mxu0 %v711_v7  ;;  %v708_v11 = vld [vmem:[%s5004_s29] sm:$0xff]  ;;  %s5005_s1 = sld [smem:[#allocation15_spill]] }
  0x28   : > { %v675_v0 = vld [vmem:[%s671_s4] sm:$0xff]  ;;  %3810 = vmatprep.subr.mxu0 %v4227_v8  ;;  %s5008_s21 = smov %s5007_s2  ;;  %s4974_s4 = smov 64  }
  0x29   : > { %v679_v1 = vsel %vm678_vm0, %v675_v0, 0.0  ;;  %3811 = vmatpush3.msra.mxu0 %v710_v9  ;;  %v3622_v18 = vld [vmem:[%s5006_s26] ss:$0 sm:$0xff]  ;;  %s4231_s0 = smov 88   ;;  %s4981_s26 = smov 56   ;;  %v793_v56 = vld [vmem:[%s5010_s6 + $0x8] sm:$0xff] }
  0x2a   : > { %680 = vadd.xlane.f32.xlu0 %v679_v1  ;;  %3812 = vmatprep.subr.mxu0 %v4227_v8  ;;  %v3623_v21 = vld [vmem:[%s5007_s2] ss:$0 sm:$0xff]  ;;  %s4975_s2 = smov 112   ;;  %s5013_s8 = sld [smem:[#allocation21_spill]] }
  0x2b   : > { %3813 = vmatpush3.msra.mxu0 %v709_v10  ;;  %v792_v60 = vld [vmem:[%s5010_s6] sm:$0xff]  ;;  %s5014_s9 = sld [smem:[#allocation22_spill]] }
  0x2c   : > { %3814 = vmatprep.subr.mxu0 %v4227_v8 }
  0x2d   : > { %3815 = vmatpush3.msra.mxu0 %v708_v11  ;;  %v3621_v16 = vld [vmem:[%s5005_s1] ss:$0 sm:$0xff]  ;;  %s5009_s1 = sld [smem:[#allocation14_spill]] }
  0x2e   : > { %3839 = vmatprep.subr.mxu0 %v4227_v8 }
  0x33   : > { %s674_s28 = scalar_lea.vmem %s5009_s1, %s4402_s23  ;;  %s4982_s23 = smov 120  }
  0x34   : > { %v4464_v27 = vld [vmem:[%s674_s28] ss:$0 sm:$0xff]  ;;  %s4977_s1 = smov 40   ;;  %s5018_s28 = smov 112  }
  0xb3   : > { %v681_v2 = vpop.xlane.xlu0 %680 }
  0xb4   : > { %v683_v3 = vmul.f32 0.03125, %v681_v2 }
  0xb6   : > { %v684_v4 = vsub.f32 %v675_v0, %v683_v3 }
  0xb8   : > { %v685_v5 = vmul.f32 %v684_v4, %v684_v4 }
  0xba   : > { %v686_v6 = vsel %vm678_vm0, %v685_v5, 0.0 }
  0xbb   : > { %687 = vadd.xlane.f32.xlu0 %v686_v6 }
 0x144   : > { %v688_v12 = vpop.xlane.xlu0 %687 }
 0x145   : > { %v689_v13 = vmul.f32 0.03125, %v688_v12 }
 0x147   : > { %v690_v14 = vadd.f32 1e-12, %v689_v13 }
 0x149   : > { %4089 = vrsqrt.f32 %v690_v14 }
 0x156   : > { %v4090_v15 = vpop.eup %4089 }
 0x157   : > { %v692_v17 = vmul.f32 %v4090_v15, %v684_v4 }
 0x159   : > { %v699_v19 = vmul.f32 %v3621_v16, %v692_v17 }
 0x15b   : > { %v4438_v20 = vadd.f32 %v3622_v18, %v699_v19 }
 0x15d   : > { %3817 = vmatmul.mubr.msk.f32.vlgmr.msra.gmra.mxu0 %vm678_vm0, %v4438_v20 }
 0x15e   : > { %3841 = vmatprep.mubr.msk.f32.mxu0 %vm4228_vm1, %v4227_v8  ;;  %3840 = vmatpush3.msra.mxu0 %v793_v56 }
 0x15f   : > { %3849 = vmatprep.subr.mxu0 %v4227_v8 }
 0x21d   : > { %v788_v22 = vpop.f32.mrf.mxu0 }
 0x21e   : > { %v4447_v23 = vadd.f32 %v3623_v21, %v788_v22 }
 0x21f   : > { %v3818_v24 = vpop.f32.mrf.mxu0 }
 0x220   : > { %893 = vrot.lane.b32.xlu0 %v4447_v23, %s4974_s4  ;;  %797 = vrot.lane.b32.xlu1 %v4447_v23, %s4230_s24  ;;  %s4976_s4 = smov 72   ;;  %v794_v24 = vld [vmem:[%s5010_s6 + $0x10] sm:$0xff] }
 0x292   : > { %v798_v25 = vpop.permute.xlu1 %797  ;;  %v894_v26 = vpop.permute.xlu0 %893 }
 0x293   : > { %3820 = vmatpush3.xpose.msk.msra.mxu1 %vm799_vm2, %v798_v25 }
 0x294   : > { %3824 = vmatprep.subr.mxu1 %v4227_v8 }
 0x296   : > { %3822 = vmatmul.mubr.msk.f32.vlgmr.msra.gmra.mxu1 %vm799_vm2, %v4447_v23 }
 0x297   : > { %3825 = vmatpush3.msra.mxu1 %v894_v26  ;;  %3826 = vmatprep.mubr.msk.f32.mxu1 %vm4228_vm1, %v4227_v8 }
 0x298   : > { %3829 = vmatprep.subr.mxu1 %v4227_v8 }
 0x356   : > { %v870_v28 = vpop.f32.mrf.mxu1 }
 0x357   : > { %v874_v29 = vmul.f32 0.35355338, %v870_v28 }
 0x358   : > { %v3823_v30 = vpop.f32.mrf.mxu1 }
 0x359   : > { %v881_v31 = vadd.f32 %v4464_v27, %v874_v29 }
 0x35b   : > { %v882_v32 = vsel %vm799_vm2, %v881_v31, -inf }
 0x35c   : > { %883 = vmax.xlane.f32.xlu1 %v882_v32 }
 0x3e5   : > { %v884_v33 = vpop.xlane.xlu1 %883 }
 0x3e6   : > { %v885_v34 = vsub.f32 %v881_v31, %v884_v33 }
 0x3e8   : > { %v886_v35 = vmul.f32 1.442695, %v885_v34 }
 0x3ea   : > { %4091 = vpow2.f32 %v886_v35 }
 0x3f7   : > { %v4092_v36 = vpop.eup %4091 }
 0x3f8   : > { %v888_v37 = vsel %vm799_vm2, %v4092_v36, 0.0 }
 0x3f9   : > { %889 = vadd.xlane.f32.xlu0 %v888_v37 }
 0x40f   : > { %971 = vrot.lane.b32.xlu0 %v4447_v23, %s4231_s0 }
 0x413   : > { %969 = vrot.lane.b32.xlu0 %v4447_v23, %s4982_s23 }
 0x482   : > { %v890_v38 = vpop.xlane.xlu0 %889 }
 0x483   : > { %4093 = vrcp.f32 %v890_v38 }
 0x486   : > { %v972_v40 = vpop.permute.xlu0 %971 }
 0x48a   : > { %v970_v42 = vpop.permute.xlu0 %969 }
 0x490   : > { %v4094_v39 = vpop.eup %4093 }
 0x491   : > { %v892_v41 = vmul.f32 %v4094_v39, %v4092_v36 }
 0x493   : > { %3827 = vmatmul.mubr.msk.f32.vlgmr.msra.gmra.mxu1 %vm799_vm2, %v892_v41  ;;  %v795_v41 = vld [vmem:[%s5010_s6 + $0x18] sm:$0xff] }
 0x494   : > { %3830 = vmatpush3.xpose.msk.msra.mxu1 %vm799_vm2, %v972_v40  ;;  %3831 = vmatprep.mubr.msk.f32.mxu1 %vm4228_vm1, %v4227_v8 }
 0x495   : > { %3834 = vmatprep.subr.mxu1 %v4227_v8 }
 0x497   : > { %3832 = vmatmul.mubr.msk.f32.vlgmr.msra.gmra.mxu1 %vm799_vm2, %v970_v42 }
 0x498   : > { %3836 = vmatprep.mubr.msk.f32.mxu1 %vm4228_vm1, %v4227_v8 }
 0x553   : > { %v965_v43 = vpop.f32.mrf.mxu1 }
 0x555   : > { %v3828_v44 = vpop.f32.mrf.mxu1 }
 0x557   : > { %v1043_v45 = vpop.f32.mrf.mxu1 }
 0x558   : > { %v1047_v46 = vmul.f32 0.35355338, %v1043_v45 }
 0x559   : > { %v3833_v47 = vpop.f32.mrf.mxu1 }
 0x55a   : > { %v1048_v48 = vadd.f32 %v4464_v27, %v1047_v46 }
 0x55c   : > { %v1049_v49 = vsel %vm799_vm2, %v1048_v48, -inf }
 0x55d   : > { %1050 = vmax.xlane.f32.xlu1 %v1049_v49  ;;  %v3642_v49 = vld [vmem:[%s5011_s7] ss:$0 sm:$0xff] }
 0x56e   : > { %1060 = vrot.lane.b32.xlu1 %v4447_v23, %s4981_s26  ;;  %s5020_s26 = smov 48  }
 0x572   : > { %1284 = vrot.lane.b32.xlu1 %v4447_v23, %s4980_s30  ;;  %s5019_s30 = smov 64  }
 0x576   : > { %1282 = vrot.lane.b32.xlu1 %v4447_v23, %s4975_s2  ;;  %s4978_s2 = smov 104  }
 0x5e6   : > { %v1051_v50 = vpop.xlane.xlu1 %1050 }
 0x5e7   : > { %v1052_v51 = vsub.f32 %v1048_v48, %v1051_v50 }
 0x5e9   : > { %v1053_v52 = vmul.f32 1.442695, %v1052_v51 }
 0x5ea   : > { %v1061_v53 = vpop.permute.xlu1 %1060 }
 0x5eb   : > { %4095 = vpow2.f32 %v1053_v52  ;;  %3835 = vmatpush3.msra.mxu1 %v1061_v53 }
 0x5ec   : > { %3844 = vmatprep.subr.mxu1 %v4227_v8 }
 0x5ee   : > { %v1285_v62 = vpop.permute.xlu1 %1284 }
 0x5f2   : > { %v1283_v1 = vpop.permute.xlu1 %1282 }
 0x5f8   : > { %v4096_v54 = vpop.eup %4095 }
 0x5f9   : > { %v1055_v55 = vsel %vm799_vm2, %v4096_v54, 0.0 }
 0x5fa   : > { %1056 = vadd.xlane.f32.xlu0 %v1055_v55 }
 0x610   : > { %1373 = vrot.lane.b32.xlu0 %v4447_v23, %s4979_s22 }
 0x683   : > { %v1057_v57 = vpop.xlane.xlu0 %1056 }
 0x684   : > { %4097 = vrcp.f32 %v1057_v57 }
 0x687   : > { %v1374_v61 = vpop.permute.xlu0 %1373 }
 0x691   : > { %v4098_v58 = vpop.eup %4097 }
 0x692   : > { %v1059_v59 = vmul.f32 %v4098_v58, %v4096_v54 }
 0x694   : > { %3837 = vmatmul.mubr.msk.f32.vlgmr.msra.gmra.mxu1 %vm799_vm2, %v1059_v59 }
 0x695   : > { %3845 = vmatpush3.msra.mxu1 %v792_v60  ;;  %3846 = vmatprep.mubr.msk.f32.mxu1 %vm4228_vm1, %v4227_v8  ;;  %v1805_v60 = vld [vmem:[%s5012_s10 + $0x18] sm:$0xff] }
 0x696   : > { %3854 = vmatprep.subr.mxu1 %v4227_v8 }
 0x698   : > { %3847 = vmatmul.mubr.msk.f32.vlgmr.msra.gmra.mxu1 %vm799_vm2, %v965_v43 }
 0x699   : > { %3855 = vmatpush3.msra.mxu1 %v1374_v61  ;;  %3856 = vmatprep.mubr.msk.f32.mxu1 %vm4228_vm1, %v4227_v8  ;;  %v1804_v61 = vld [vmem:[%s5012_s10 + $0x10] sm:$0xff] }
 0x69a   : > { %3864 = vmatprep.subr.mxu1 %v4227_v8 }
 0x754   : > { %v1132_v63 = vpop.f32.mrf.mxu1 }
 0x755   : > { %3842 = vmatmul.mubr.msk.f32.vlgmr.msra.gmra.mxu0 %vm799_vm2, %v1132_v63 }
 0x756   : > { %3850 = vmatpush3.xpose.msk.msra.mxu0 %vm799_vm2, %v1285_v62  ;;  %v3838_v0 = vpop.f32.mrf.mxu1  ;;  %3851 = vmatprep.mubr.msk.f32.mxu0 %vm4228_vm1, %v4227_v8  ;;  %v1802_v62 = vld [vmem:[%s5012_s10] sm:$0xff] }
 0x757   : > { %3859 = vmatprep.subr.mxu0 %v4227_v8 }
 0x758   : > { %v1278_v2 = vpop.f32.mrf.mxu1 }
 0x759   : > { %3852 = vmatmul.mubr.msk.f32.vlgmr.msra.gmra.mxu0 %vm799_vm2, %v1283_v1 }
 0x75a   : > { %v3848_v3 = vpop.f32.mrf.mxu1  ;;  %3861 = vmatprep.mubr.msk.f32.mxu0 %vm4228_vm1, %v4227_v8  ;;  %3860 = vmatpush3.msra.mxu0 %v794_v24 }
 0x75b   : > { %3869 = vmatprep.subr.mxu0 %v4227_v8  ;;  %v3643_v3 = vld [vmem:[%s5013_s8] ss:$0 sm:$0xff] }
 0x815   : > { %v1205_v4 = vpop.f32.mrf.mxu0 }
 0x816   : > { %v1279_v39 = vadd.f32 %v1278_v2, %v1205_v4 }
 0x817   : > { %v3843_v5 = vpop.f32.mrf.mxu0 }
 0x818   : > { %v3644_v5 = vld [vmem:[%s5014_s9] ss:$0 sm:$0xff] }
 0x819   : > { %v1356_v6 = vpop.f32.mrf.mxu0 }
 0x81a   : > { %v1360_v7 = vmul.f32 0.35355338, %v1356_v6 }
 0x81b   : > { %v3853_v9 = vpop.f32.mrf.mxu0 }
 0x81c   : > { %v1361_v10 = vadd.f32 %v4464_v27, %v1360_v7  ;;  %v1902_v9 = vld [vmem:[%s4956_s12 + $0x38] sm:$0xff] }
 0x81e   : > { %v1362_v11 = vsel %vm799_vm2, %v1361_v10, -inf }
 0x81f   : > { %1363 = vmax.xlane.f32.xlu1 %v1362_v11  ;;  %v1900_v11 = vld [vmem:[%s4956_s12 + $0x28] sm:$0xff] }
 0x8a8   : > { %v1364_v12 = vpop.xlane.xlu1 %1363 }
 0x8a9   : > { %v1365_v13 = vsub.f32 %v1361_v10, %v1364_v12  ;;  %v1901_v10 = vld [vmem:[%s4956_s12 + $0x30] sm:$0xff]  ;;  %v1899_v12 = vld [vmem:[%s4956_s12 + $0x20] sm:$0xff] }
 0x8ab   : > { %v1366_v14 = vmul.f32 1.442695, %v1365_v13  ;;  %v1898_v13 = vld [vmem:[%s4956_s12 + $0x18] sm:$0xff] }
 0x8ad   : > { %4099 = vpow2.f32 %v1366_v14  ;;  %v1897_v14 = vld [vmem:[%s4956_s12 + $0x10] sm:$0xff] }
 0x8ba   : > { %v4100_v15 = vpop.eup %4099 }
 0x8bb   : > { %v1368_v16 = vsel %vm799_vm2, %v4100_v15, 0.0 }
 0x8bc   : > { %1369 = vadd.xlane.f32.xlu0 %v1368_v16  ;;  %v1895_v16 = vld [vmem:[%s4956_s12] sm:$0xff] }
 0x8d2   : > { %1525 = vrot.lane.b32.xlu0 %v4447_v23, %s4976_s4  ;;  %s5015_s4 = smov 120  }
 0x8d6   : > { %1523 = vrot.lane.b32.xlu0 %v4447_v23, %s4978_s2 }
 0x945   : > { %v1370_v17 = vpop.xlane.xlu0 %1369 }
 0x946   : > { %4101 = vrcp.f32 %v1370_v17  ;;  %v3645_v17 = vld [vmem:[%s4955_s11] ss:$0 sm:$0xff] }
 0x949   : > { %v1526_v19 = vpop.permute.xlu0 %1525 }
 0x94d   : > { %v1524_v22 = vpop.permute.xlu0 %1523 }
 0x953   : > { %v4102_v18 = vpop.eup %4101 }
 0x954   : > { %v1372_v21 = vmul.f32 %v4102_v18, %v4100_v15  ;;  %v1896_v15 = vld [vmem:[%s4956_s12 + $0x8] sm:$0xff] }
 0x956   : > { %3857 = vmatmul.mubr.msk.f32.vlgmr.msra.gmra.mxu1 %vm799_vm2, %v1372_v21 }
 0x957   : > { %3865 = vmatpush3.xpose.msk.msra.mxu1 %vm799_vm2, %v1526_v19  ;;  %3866 = vmatprep.mubr.msk.f32.mxu1 %vm4228_vm1, %v4227_v8 }
 0x958   : > { %3874 = vmatprep.subr.mxu1 %v4227_v8 }
 0x95a   : > { %3867 = vmatmul.mubr.msk.f32.vlgmr.msra.gmra.mxu1 %vm799_vm2, %v1524_v22 }
 0x95b   : > { %3876 = vmatprep.mubr.msk.f32.mxu1 %vm4228_vm1, %v4227_v8  ;;  %3875 = vmatpush3.msra.mxu1 %v795_v41 }
 0x95c   : > { %3890 = vmatprep.subr.mxu1 %v4227_v8 }
 0xa16   : > { %v1445_v25 = vpop.f32.mrf.mxu1 }
 0xa17   : > { %3862 = vmatmul.mubr.msk.f32.vlgmr.msra.gmra.mxu0 %vm799_vm2, %v1445_v25 }
 0xa18   : > { %v3858_v26 = vpop.f32.mrf.mxu1  ;;  %3871 = vmatprep.mubr.msk.f32.mxu0 %vm4228_vm1, %v4227_v8 }
 0xa1a   : > { %v1597_v28 = vpop.f32.mrf.mxu1 }
 0xa1b   : > { %v1601_v29 = vmul.f32 0.35355338, %v1597_v28 }
 0xa1c   : > { %v3868_v30 = vpop.f32.mrf.mxu1 }
 0xa1d   : > { %v1602_v31 = vadd.f32 %v4464_v27, %v1601_v29 }
 0xa1f   : > { %v1603_v32 = vsel %vm799_vm2, %v1602_v31, -inf }
 0xa20   : > { %1604 = vmax.xlane.f32.xlu1 %v1603_v32 }
 0xa31   : > { %1614 = vrot.lane.b32.xlu1 %v4447_v23, %s4977_s1  ;;  %s4983_s1 = sshll.u32 %s4373_s3, 4 }
 0xaa9   : > { %v1605_v33 = vpop.xlane.xlu1 %1604 }
 0xaaa   : > { %v1606_v34 = vsub.f32 %v1602_v31, %v1605_v33  ;;  %v3647_v33 = vld [vmem:[%s4957_s13] ss:$0 sm:$0xff] }
 0xaac   : > { %v1607_v35 = vmul.f32 1.442695, %v1606_v34 }
 0xaad   : > { %v1615_v36 = vpop.permute.xlu1 %1614 }
 0xaae   : > { %4103 = vpow2.f32 %v1607_v35  ;;  %3870 = vmatpush3.msra.mxu0 %v1615_v36 }
 0xaaf   : > { %3879 = vmatprep.subr.mxu0 %v4227_v8 }
 0xabb   : > { %v4104_v37 = vpop.eup %4103 }
 0xabc   : > { %v1609_v38 = vsel %vm799_vm2, %v4104_v37, 0.0 }
 0xabd   : > { %1610 = vadd.xlane.f32.xlu0 %v1609_v38 }
 0xad7   : > { %v1518_v40 = vpop.f32.mrf.mxu0 }
 0xad8   : > { %v1522_v42 = vadd.f32 %v1518_v40, %v1279_v39 }
 0xad9   : > { %v3863_v23 = vpop.f32.mrf.mxu0 }
 0xb46   : > { %v1611_v43 = vpop.xlane.xlu0 %1610 }
 0xb47   : > { %4105 = vrcp.f32 %v1611_v43  ;;  %v3654_v43 = vld [vmem:[%s5004_s29 + $0x38] sm:$0xff] }
 0xb54   : > { %v4106_v44 = vpop.eup %4105 }
 0xb55   : > { %v1613_v45 = vmul.f32 %v4106_v44, %v4104_v37  ;;  %v3653_v44 = vld [vmem:[%s5004_s29 + $0x30] sm:$0xff] }
 0xb57   : > { %3872 = vmatmul.mubr.msk.f32.vlgmr.msra.gmra.mxu0 %vm799_vm2, %v1613_v45  ;;  %v3652_v45 = vld [vmem:[%s5004_s29 + $0x28] sm:$0xff] }
 0xb58   : > { %3887 = vmatprep.mubr.msk.f32.mxu0 %vm4228_vm1, %v4227_v8  ;;  %3880 = vmatpush3.msra.mxu0 %v1805_v60 }
 0xb59   : > { %3881 = vmatprep.subr.mxu0 %v4227_v8 }
 0xb5a   : > { %3882 = vmatpush3.msra.mxu0 %v1804_v61 }
 0xb5b   : > { %3883 = vmatprep.subr.mxu0 %v4227_v8 }
 0xc17   : > { %v1686_v46 = vpop.f32.mrf.mxu0 }
 0xc18   : > { %3877 = vmatmul.mubr.msk.f32.vlgmr.msra.gmra.mxu1 %vm799_vm2, %v1686_v46  ;;  %v3651_v46 = vld [vmem:[%s5004_s29 + $0x20] sm:$0xff] }
 0xc19   : > { %v3873_v47 = vpop.f32.mrf.mxu0  ;;  %3906 = vmatprep.mubr.msk.f32.mxu1 %vm4228_vm1, %v4227_v8  ;;  %3891 = vmatpush3.msra.mxu1 %v1902_v9 }
 0xc1a   : > { %3892 = vmatprep.subr.mxu1 %v4227_v8 }
 0xc1b   : > { %3893 = vmatpush3.msra.mxu1 %v1901_v10 }
 0xc1c   : > { %3894 = vmatprep.subr.mxu1 %v4227_v8 }
 0xc1d   : > { %3895 = vmatpush3.msra.mxu1 %v1900_v11 }
 0xc1e   : > { %3896 = vmatprep.subr.mxu1 %v4227_v8 }
 0xc1f   : > { %3897 = vmatpush3.msra.mxu1 %v1899_v12 }
 0xc20   : > { %3898 = vmatprep.subr.mxu1 %v4227_v8 }
 0xc21   : > { %3899 = vmatpush3.msra.mxu1 %v1898_v13 }
 0xc22   : > { %3900 = vmatprep.subr.mxu1 %v4227_v8 }
 0xc23   : > { %3901 = vmatpush3.msra.mxu1 %v1897_v14 }
 0xc24   : > { %3902 = vmatprep.subr.mxu1 %v4227_v8 }
 0xc25   : > { %3903 = vmatpush3.msra.mxu1 %v1896_v15 }
 0xc26   : > { %3904 = vmatprep.subr.mxu1 %v4227_v8 }
 0xc27   : > { %3905 = vmatpush3.msra.mxu1 %v1895_v16 }
 0xc28   : > { %3925 = vmatprep.subr.mxu1 %v4227_v8 }
 0xcd8   : > { %v1759_v48 = vpop.f32.mrf.mxu1 }
 0xcd9   : > { %v1763_v50 = vadd.f32 %v1759_v48, %v1522_v42 }
 0xcda   : > { %v3878_v51 = vpop.f32.mrf.mxu1 }
 0xcdb   : > { %v1771_v52 = vadd.f32 %v3642_v49, %v1763_v50  ;;  %v3649_v51 = vld [vmem:[%s4958_s14] ss:$0 sm:$0xff] }
 0xcdd   : > { %v1772_v53 = vadd.f32 %v1771_v52, %v4438_v20  ;;  %v1803_v20 = vld [vmem:[%s5012_s10 + $0x8] sm:$0xff] }
 0xcde   : > { %3884 = vmatpush3.msra.mxu0 %v1803_v20 }
 0xcdf   : > { %v1775_v54 = vsel %vm678_vm0, %v1772_v53, 0.0  ;;  %3885 = vmatprep.subr.mxu0 %v4227_v8 }
 0xce0   : > { %1776 = vadd.xlane.f32.xlu1 %v1775_v54  ;;  %3886 = vmatpush3.msra.mxu0 %v1802_v62 }
 0xce1   : > { %3909 = vmatprep.subr.mxu0 %v4227_v8 }
 0xd69   : > { %v1777_v55 = vpop.xlane.xlu1 %1776 }
 0xd6a   : > { %v1778_v56 = vmul.f32 0.03125, %v1777_v55 }
 0xd6c   : > { %v1779_v57 = vsub.f32 %v1772_v53, %v1778_v56  ;;  %v3650_v53 = vld [vmem:[%s4959_s15] ss:$0 sm:$0xff]  ;;  %v3656_v56 = vld [vmem:[%s5008_s21 + $0x1] ss:$0 sm:$0xff] }
 0xd6e   : > { %v1780_v58 = vmul.f32 %v1779_v57, %v1779_v57 }
 0xd70   : > { %v1781_v59 = vsel %vm678_vm0, %v1780_v58, 0.0 }
 0xd71   : > { %1782 = vadd.xlane.f32.xlu0 %v1781_v59 }
 0xdfa   : > { %v1783_v63 = vpop.xlane.xlu0 %1782 }
 0xdfb   : > { %v1784_v0 = vmul.f32 0.03125, %v1783_v63 }
 0xdfd   : > { %v1785_v1 = vadd.f32 1e-12, %v1784_v0 }
 0xdff   : > { %4107 = vrsqrt.f32 %v1785_v1 }
 0xe0c   : > { %v4108_v2 = vpop.eup %4107 }
 0xe0d   : > { %v1787_v4 = vmul.f32 %v4108_v2, %v1779_v57 }
 0xe0f   : > { %v1794_v6 = vmul.f32 %v3643_v3, %v1787_v4 }
 0xe11   : > { %v1801_v7 = vadd.f32 %v3644_v5, %v1794_v6 }
 0xe13   : > { %3888 = vmatmul.mubr.msk.f32.vlgmr.msra.gmra.mxu0 %vm678_vm0, %v1801_v7 }
 0xe14   : > { %3917 = vmatprep.mubr.msk.f32.mxu0 %vm4228_vm1, %v4227_v8  ;;  %3910 = vmatpush3.msra.mxu0 %v3654_v43 }
 0xe15   : > { %3911 = vmatprep.subr.mxu0 %v4227_v8 }
 0xe16   : > { %3912 = vmatpush3.msra.mxu0 %v3653_v44 }
 0xe17   : > { %3913 = vmatprep.subr.mxu0 %v4227_v8 }
 0xe18   : > { %3914 = vmatpush3.msra.mxu0 %v3652_v45 }
 0xe19   : > { %3915 = vmatprep.subr.mxu0 %v4227_v8 }
 0xe1a   : > { %3916 = vmatpush3.msra.mxu0 %v3651_v46 }
 0xe1b   : > { %3920 = vmatprep.subr.mxu0 %v4227_v8 }
 0xed3   : > { %v1882_v18 = vpop.f32.mrf.mxu0 }
 0xed4   : > { %v1883_v19 = vadd.f32 %v3645_v17, %v1882_v18 }
 0xed5   : > { %v3889_v21 = vpop.f32.mrf.mxu0 }
 0xed6   : > { %v1887_v22 = vmul.f32 0.044715, %v1883_v19  ;;  %v1886_v30 = vmul.f32 0.5, %v1883_v19 }
 0xed8   : > { %v1888_v24 = vmul.f32 %v1887_v22, %v1883_v19 }
 0xeda   : > { %v1889_v25 = vmul.f32 %v1888_v24, %v1883_v19 }
 0xedc   : > { %v1890_v26 = vadd.f32 %v1889_v25, %v1883_v19 }
 0xede   : > { %v1891_v28 = vmul.f32 0.7978846, %v1890_v26 }
 0xee0   : > { %4109 = vtanh.f32 %v1891_v28 }
 0xeed   : > { %v4110_v29 = vpop.eup %4109 }
 0xeee   : > { %v1893_v31 = vadd.f32 1.0, %v4110_v29 }
 0xef0   : > { %v1894_v32 = vmul.f32 %v1893_v31, %v1886_v30  ;;  %v3658_v30 = vld [vmem:[%s5010_s6 + $0x20] sm:$0xff]  ;;  %v3659_v31 = vld [vmem:[%s5010_s6 + $0x28] sm:$0xff] }
 0xef2   : > { %3907 = vmatmul.mubr.msk.f32.vlgmr.msra.gmra.mxu1 %vm1910_vm3, %v1894_v32 }
 0xef3   : > { %3927 = vmatprep.mubr.msk.f32.mxu1 %vm4228_vm1, %v4227_v8 }
 0xfb2   : > { %v1980_v34 = vpop.f32.mrf.mxu1 }
 0xfb3   : > { %v1981_v35 = vadd.f32 %v3647_v33, %v1980_v34 }
 0xfb4   : > { %v3908_v36 = vpop.f32.mrf.mxu1 }
 0xfb5   : > { %v1984_v37 = vadd.f32 %v1981_v35, %v1801_v7 }
 0xfb7   : > { %v1987_v38 = vsel %vm678_vm0, %v1984_v37, 0.0 }
 0xfb8   : > { %1988 = vadd.xlane.f32.xlu0 %v1987_v38 }
0x1041   : > { %v1989_v39 = vpop.xlane.xlu0 %1988 }
0x1042   : > { %v1990_v40 = vmul.f32 0.03125, %v1989_v39 }
0x1044   : > { %v1991_v41 = vsub.f32 %v1984_v37, %v1990_v40 }
0x1046   : > { %v1992_v42 = vmul.f32 %v1991_v41, %v1991_v41 }
0x1048   : > { %v1993_v23 = vsel %vm678_vm0, %v1992_v42, 0.0 }
0x1049   : > { %1994 = vadd.xlane.f32.xlu0 %v1993_v23 }
0x10d2   : > { %v1995_v47 = vpop.xlane.xlu0 %1994 }
0x10d3   : > { %v1996_v48 = vmul.f32 0.03125, %v1995_v47 }
0x10d5   : > { %v1997_v49 = vadd.f32 1e-12, %v1996_v48 }
0x10d7   : > { %4111 = vrsqrt.f32 %v1997_v49 }
0x10e4   : > { %v4112_v50 = vpop.eup %4111 }
0x10e5   : > { %v1999_v52 = vmul.f32 %v4112_v50, %v1991_v41 }
0x10e7   : > { %v2006_v54 = vmul.f32 %v3649_v51, %v1999_v52 }
0x10e9   : > { %v4650_v55 = vadd.f32 %v3650_v53, %v2006_v54 }
0x10eb   : > { %3918 = vmatmul.mubr.msk.f32.vlgmr.msra.gmra.mxu0 %vm678_vm0, %v4650_v55 }
0x10ec   : > { %3922 = vmatprep.mubr.msk.f32.mxu0 %vm4228_vm1, %v4227_v8 }
0x11ab   : > { %v2096_v57 = vpop.f32.mrf.mxu0 }
0x11ac   : > { %v4659_v58 = vadd.f32 %v3656_v56, %v2096_v57 }
0x11ad   : > { %v3919_v59 = vpop.f32.mrf.mxu0 }
0x11ae   : > { %2273 = vrot.lane.b32.xlu1 %v4659_v58, %s4231_s0  ;;  %2106 = vrot.lane.b32.xlu0 %v4659_v58, %s4230_s24  ;;  %s5016_s24 = smov 56   ;;  %s5017_s0 = smov 80  }
0x11b2   : > { %2271 = vrot.lane.b32.xlu0 %v4659_v58, %s5015_s4  ;;  %s5021_s4 = smov 104  }
0x1220   : > { %v2107_v60 = vpop.permute.xlu0 %2106  ;;  %v2274_v61 = vpop.permute.xlu1 %2273 }
0x1221   : > { %3921 = vmatpush3.xpose.msk.msra.mxu0 %vm799_vm2, %v2107_v60  ;;  %v3660_v60 = vld [vmem:[%s5010_s6 + $0x30] sm:$0xff] }
0x1222   : > { %3930 = vmatprep.subr.mxu0 %v4227_v8 }
0x1224   : > { %3923 = vmatmul.mubr.msk.f32.vlgmr.msra.gmra.mxu0 %vm799_vm2, %v4659_v58  ;;  %v2272_v20 = vpop.permute.xlu0 %2271 }
0x1225   : > { %3931 = vmatpush3.xpose.msk.msra.mxu0 %vm799_vm2, %v2274_v61  ;;  %3932 = vmatprep.mubr.msk.f32.mxu0 %vm4228_vm1, %v4227_v8 }
0x1226   : > { %3940 = vmatprep.subr.mxu0 %v4227_v8 }
0x1228   : > { %3933 = vmatmul.mubr.msk.f32.vlgmr.msra.gmra.mxu0 %vm799_vm2, %v2272_v20 }
0x1229   : > { %3942 = vmatprep.mubr.msk.f32.mxu0 %vm4228_vm1, %v4227_v8  ;;  %3941 = vmatpush3.msra.mxu0 %v3659_v31 }
0x122a   : > { %3950 = vmatprep.subr.mxu0 %v4227_v8 }
0x12e4   : > { %v2178_v62 = vpop.f32.mrf.mxu0 }
0x12e5   : > { %v2182_v63 = vmul.f32 0.35355338, %v2178_v62 }
0x12e6   : > { %v3924_v0 = vpop.f32.mrf.mxu0 }
0x12e7   : > { %v2183_v1 = vadd.f32 %v4464_v27, %v2182_v63 }
0x12e8   : > { %v2345_v2 = vpop.f32.mrf.mxu0 }
0x12e9   : > { %v2349_v3 = vmul.f32 0.35355338, %v2345_v2  ;;  %v2184_v4 = vsel %vm799_vm2, %v2183_v1, -inf }
0x12ea   : > { %2185 = vmax.xlane.f32.xlu0 %v2184_v4  ;;  %v3934_v5 = vpop.f32.mrf.mxu0 }
0x12eb   : > { %v2350_v6 = vadd.f32 %v4464_v27, %v2349_v3 }
0x12ed   : > { %v2351_v7 = vsel %vm799_vm2, %v2350_v6, -inf }
0x12ee   : > { %2352 = vmax.xlane.f32.xlu1 %v2351_v7 }
0x12ff   : > { %2362 = vrot.lane.b32.xlu1 %v4659_v58, %s5016_s24  ;;  %s5022_s24 = smov 72  }
0x1303   : > { %2586 = vrot.lane.b32.xlu1 %v4659_v58, %s5017_s0 }
0x1307   : > { %2584 = vrot.lane.b32.xlu1 %v4659_v58, %s5018_s28  ;;  %s4855_s28 = sand.u32 1, %s4217_s25  }
0x1308   : > { %s661_s2 = scalar_lea.vmem [#allocation2], %s4855_s28  ;;  %s3495_s0 = scalar_lea.sflag [#allocation3], %s4855_s28 }
0x1373   : > { %v2186_v9 = vpop.xlane.xlu0 %2185 }
0x1374   : > { %v2187_v10 = vsub.f32 %v2183_v1, %v2186_v9 }
0x1376   : > { %v2188_v11 = vmul.f32 1.442695, %v2187_v10  ;;  %v3661_v10 = vld [vmem:[%s5010_s6 + $0x38] sm:$0xff] }
0x1377   : > { %v2353_v12 = vpop.xlane.xlu1 %2352 }
0x1378   : > { %4113 = vpow2.f32 %v2188_v11  ;;  %v2354_v13 = vsub.f32 %v2350_v6, %v2353_v12 }
0x137a   : > { %v2355_v14 = vmul.f32 1.442695, %v2354_v13 }
0x137b   : > { %v2363_v26 = vpop.permute.xlu1 %2362 }
0x137c   : > { %4115 = vpow2.f32 %v2355_v14 }
0x137f   : > { %v2587_v33 = vpop.permute.xlu1 %2586 }
0x1383   : > { %v2585_v37 = vpop.permute.xlu1 %2584 }
0x1385   : > { %v4114_v15 = vpop.eup %4113 }
0x1386   : > { %v2190_v16 = vsel %vm799_vm2, %v4114_v15, 0.0 }
0x1387   : > { %2191 = vadd.xlane.f32.xlu0 %v2190_v16 }
0x1389   : > { %v4116_v17 = vpop.eup %4115 }
0x138a   : > { %v2357_v18 = vsel %vm799_vm2, %v4116_v17, 0.0 }
0x138b   : > { %2358 = vadd.xlane.f32.xlu0 %v2357_v18  ;;  %v3679_v18 = vld [vmem:[%s5011_s7 + $0x1] ss:$0 sm:$0xff] }
0x13a1   : > { %2195 = vrot.lane.b32.xlu0 %v4659_v58, %s5019_s30  ;;  %s5023_s30 = smov 40  }
0x1410   : > { %v2192_v19 = vpop.xlane.xlu0 %2191 }
0x1411   : > { %4117 = vrcp.f32 %v2192_v19 }
0x1414   : > { %v2359_v21 = vpop.xlane.xlu0 %2358 }
0x1415   : > { %4119 = vrcp.f32 %v2359_v21 }
0x1418   : > { %v2196_v22 = vpop.permute.xlu0 %2195 }
0x1419   : > { %3926 = vmatpush3.msra.mxu1 %v2196_v22 }
0x141a   : > { %3935 = vmatprep.subr.mxu1 %v4227_v8 }
0x141e   : > { %v4118_v24 = vpop.eup %4117 }
0x141f   : > { %v2194_v25 = vmul.f32 %v4118_v24, %v4114_v15 }
0x1421   : > { %3928 = vmatmul.mubr.msk.f32.vlgmr.msra.gmra.mxu1 %vm799_vm2, %v2194_v25 }
0x1422   : > { %v4120_v28 = vpop.eup %4119  ;;  %3936 = vmatpush3.msra.mxu1 %v2363_v26  ;;  %3937 = vmatprep.mubr.msk.f32.mxu1 %vm4228_vm1, %v4227_v8 }
0x1423   : > { %v2361_v29 = vmul.f32 %v4120_v28, %v4116_v17  ;;  %3945 = vmatprep.subr.mxu1 %v4227_v8 }
0x1425   : > { %3938 = vmatmul.mubr.msk.f32.vlgmr.msra.gmra.mxu1 %vm799_vm2, %v2361_v29 }
0x1426   : > { %3947 = vmatprep.mubr.msk.f32.mxu1 %vm4228_vm1, %v4227_v8  ;;  %3946 = vmatpush3.msra.mxu1 %v3658_v30 }
0x1427   : > { %3955 = vmatprep.subr.mxu1 %v4227_v8 }
0x14e1   : > { %v2267_v32 = vpop.f32.mrf.mxu1 }
0x14e2   : > { %3948 = vmatmul.mubr.msk.f32.vlgmr.msra.gmra.mxu1 %vm799_vm2, %v2267_v32  ;;  %v3687_v32 = vld [vmem:[%s5012_s10 + $0x38] sm:$0xff] }
0x14e3   : > { %v3929_v34 = vpop.f32.mrf.mxu1  ;;  %3957 = vmatprep.mubr.msk.f32.mxu1 %vm4228_vm1, %v4227_v8 }
0x14e4   : > { %v3684_v34 = vld [vmem:[%s5012_s10 + $0x20] sm:$0xff] }
0x14e5   : > { %v2434_v35 = vpop.f32.mrf.mxu1 }
0x14e6   : > { %3943 = vmatmul.mubr.msk.f32.vlgmr.msra.gmra.mxu0 %vm799_vm2, %v2434_v35 }
0x14e7   : > { %3951 = vmatpush3.xpose.msk.msra.mxu0 %vm799_vm2, %v2587_v33  ;;  %v3939_v36 = vpop.f32.mrf.mxu1  ;;  %3952 = vmatprep.mubr.msk.f32.mxu0 %vm4228_vm1, %v4227_v8  ;;  %v3686_v33 = vld [vmem:[%s5012_s10 + $0x30] sm:$0xff] }
0x14e8   : > { %3960 = vmatprep.subr.mxu0 %v4227_v8 }
0x14ea   : > { %3953 = vmatmul.mubr.msk.f32.vlgmr.msra.gmra.mxu0 %vm799_vm2, %v2585_v37 }
0x14eb   : > { %3962 = vmatprep.mubr.msk.f32.mxu0 %vm4228_vm1, %v4227_v8  ;;  %3961 = vmatpush3.msra.mxu0 %v3660_v60 }
0x14ec   : > { %3970 = vmatprep.subr.mxu0 %v4227_v8 }
0x15a2   : > { %v2580_v38 = vpop.f32.mrf.mxu1 }
0x15a4   : > { %v3949_v39 = vpop.f32.mrf.mxu1 }
0x15a5   : > { %v3682_v39 = vld [vmem:[%s5013_s8 + $0x1] ss:$0 sm:$0xff] }
0x15a6   : > { %v2507_v40 = vpop.f32.mrf.mxu0 }
0x15a7   : > { %v2581_v41 = vadd.f32 %v2580_v38, %v2507_v40 }
0x15a8   : > { %v3944_v42 = vpop.f32.mrf.mxu0 }
0x15aa   : > { %v2658_v23 = vpop.f32.mrf.mxu0 }
0x15ab   : > { %v2662_v43 = vmul.f32 0.35355338, %v2658_v23 }
0x15ac   : > { %v3954_v44 = vpop.f32.mrf.mxu0 }
0x15ad   : > { %v2663_v45 = vadd.f32 %v4464_v27, %v2662_v43  ;;  %v3698_v43 = vld [vmem:[%s4956_s12 + $0x78] sm:$0xff]  ;;  %v3697_v44 = vld [vmem:[%s4956_s12 + $0x70] sm:$0xff] }
0x15af   : > { %v2664_v46 = vsel %vm799_vm2, %v2663_v45, -inf }
0x15b0   : > { %2665 = vmax.xlane.f32.xlu0 %v2664_v46  ;;  %v3695_v46 = vld [vmem:[%s4956_s12 + $0x60] sm:$0xff] }
0x15c6   : > { %2675 = vrot.lane.b32.xlu0 %v4659_v58, %s5020_s26 }
0x15ca   : > { %2825 = vrot.lane.b32.xlu0 %v4659_v58, %s5021_s4  ;;  %s3509_s4 = scalar_lea.hbm %s4964_s20, %s4983_s1 }
0x1639   : > { %v2666_v47 = vpop.xlane.xlu0 %2665 }
0x163a   : > { %v2667_v48 = vsub.f32 %v2663_v45, %v2666_v47  ;;  %v3696_v45 = vld [vmem:[%s4956_s12 + $0x68] sm:$0xff]  ;;  %v3694_v47 = vld [vmem:[%s4956_s12 + $0x58] sm:$0xff] }
0x163c   : > { %v2668_v49 = vmul.f32 1.442695, %v2667_v48  ;;  %v3693_v48 = vld [vmem:[%s4956_s12 + $0x50] sm:$0xff] }
0x163d   : > { %v2676_v50 = vpop.permute.xlu0 %2675 }
0x163e   : > { %4121 = vpow2.f32 %v2668_v49  ;;  %3956 = vmatpush3.msra.mxu1 %v2676_v50  ;;  %v3692_v49 = vld [vmem:[%s4956_s12 + $0x48] sm:$0xff]  ;;  %v3691_v50 = vld [vmem:[%s4956_s12 + $0x40] sm:$0xff] }
0x163f   : > { %3965 = vmatprep.subr.mxu1 %v4227_v8 }
0x1641   : > { %v2826_v59 = vpop.permute.xlu0 %2825 }
0x164b   : > { %v4122_v51 = vpop.eup %4121 }
0x164c   : > { %v2670_v52 = vsel %vm799_vm2, %v4122_v51, 0.0 }
0x164d   : > { %2671 = vadd.xlane.f32.xlu1 %v2670_v52 }
0x165e   : > { %2827 = vrot.lane.b32.xlu1 %v4659_v58, %s5022_s24  ;;  %s3511_s24 = sshll.u32 %s661_s2, 4  ;;  %s3512_s24 = int_to_ptr.vmem [resolvable:$true] %s3511_s24 }
0x165f   : > { %s4135_s6 = scalar_lea.vmem %s3512_s24, 16 }
0x1660   : > { %p4136_p11 = scmp.ne.s32.totalorder %s3512_s24, %s4135_s6 }
0x1662   : > { %p4137_p12 = pnand %p4136_p11, %p4390_p5 }
0x1664   : > { %p4138_p13 = pneg %p4137_p12 }
0x16d6   : > { %v2672_v53 = vpop.xlane.xlu1 %2671 }
0x16d7   : > { %4123 = vrcp.f32 %v2672_v53 }
0x16da   : > { %v2828_v57 = vpop.permute.xlu1 %2827 }
0x16e4   : > { %v4124_v54 = vpop.eup %4123 }
0x16e5   : > { %v2674_v56 = vmul.f32 %v4124_v54, %v4122_v51  ;;  %v3689_v51 = vld [vmem:[%s4955_s11 + $0x1] ss:$0 sm:$0xff] }
0x16e7   : > { %3958 = vmatmul.mubr.msk.f32.vlgmr.msra.gmra.mxu1 %vm799_vm2, %v2674_v56 }
0x16e8   : > { %3966 = vmatpush3.xpose.msk.msra.mxu1 %vm799_vm2, %v2828_v57  ;;  %3967 = vmatprep.mubr.msk.f32.mxu1 %vm4228_vm1, %v4227_v8 }
0x16e9   : > { %3975 = vmatprep.subr.mxu1 %v4227_v8 }
0x16eb   : > { %3968 = vmatmul.mubr.msk.f32.vlgmr.msra.gmra.mxu1 %vm799_vm2, %v2826_v59 }
0x16ec   : > { %3977 = vmatprep.mubr.msk.f32.mxu1 %vm4228_vm1, %v4227_v8  ;;  %3976 = vmatpush3.msra.mxu1 %v3661_v10 }
0x16ed   : > { %3991 = vmatprep.subr.mxu1 %v4227_v8 }
0x17a7   : > { %v2747_v61 = vpop.f32.mrf.mxu1 }
0x17a8   : > { %3963 = vmatmul.mubr.msk.f32.vlgmr.msra.gmra.mxu0 %vm799_vm2, %v2747_v61 }
0x17a9   : > { %v3959_v20 = vpop.f32.mrf.mxu1  ;;  %3972 = vmatprep.mubr.msk.f32.mxu0 %vm4228_vm1, %v4227_v8 }
0x17ab   : > { %v2899_v62 = vpop.f32.mrf.mxu1 }
0x17ac   : > { %v2903_v63 = vmul.f32 0.35355338, %v2899_v62 }
0x17ad   : > { %v3969_v0 = vpop.f32.mrf.mxu1 }
0x17ae   : > { %v2904_v1 = vadd.f32 %v4464_v27, %v2903_v63 }
0x17b0   : > { %v2905_v2 = vsel %vm799_vm2, %v2904_v1, -inf }
0x17b1   : > { %2906 = vmax.xlane.f32.xlu1 %v2905_v2 }
0x183a   : > { %v2907_v3 = vpop.xlane.xlu1 %2906 }
0x183b   : > { %v2908_v4 = vsub.f32 %v2904_v1, %v2907_v3  ;;  %v3700_v1 = vld [vmem:[%s4957_s13 + $0x1] ss:$0 sm:$0xff] }
0x183d   : > { %v2909_v5 = vmul.f32 1.442695, %v2908_v4 }
0x183f   : > { %4125 = vpow2.f32 %v2909_v5 }
0x184c   : > { %v4126_v6 = vpop.eup %4125 }
0x184d   : > { %v2911_v7 = vsel %vm799_vm2, %v4126_v6, 0.0 }
0x184e   : > { %2912 = vadd.xlane.f32.xlu0 %v2911_v7 }
0x1864   : > { %2916 = vrot.lane.b32.xlu0 %v4659_v58, %s5023_s30  ;;  %s4240_s30 = smov [#allocation2]  }
0x1865   : > { %s4139_s22 = sshll.u32 %s4240_s30, 4  ;;  %s4140_s22 = int_to_ptr.vmem [resolvable:$false] %s4139_s22 }
0x1866   : > { %s4141_s7 = scalar_lea.vmem %s4140_s22, 32  ;;  %p4142_p0 = scmp.lt.s32.totalorder %s3512_s24, %s4140_s22 }
0x1867   : > { %p4143_p1 = scmp.lt.s32.totalorder %s4141_s7, %s4135_s6 }
0x1868   : > { %v2820_v9 = vpop.f32.mrf.mxu0 }
0x1869   : > { %v2824_v27 = vadd.f32 %v2820_v9, %v2581_v41  ;;  %v3683_v41 = vld [vmem:[%s5014_s9 + $0x1] ss:$0 sm:$0xff]  ;;  %p4144_p2 = por %p4143_p1, %p4142_p0 }
0x186a   : > { %v3964_v11 = vpop.f32.mrf.mxu0 }
0x186b   : > { %p4145_p3 = pnand %p4144_p2, %p4138_p13 }
0x18d7   : > { %v2913_v12 = vpop.xlane.xlu0 %2912 }
0x18d8   : > { %4127 = vrcp.f32 %v2913_v12  ;;  %v3338_v12 = vld [vmem:[%s4960_s16 + $0x18] sm:$0xff] }
0x18db   : > { %v2917_v13 = vpop.permute.xlu0 %2916 }
0x18dc   : > { %3971 = vmatpush3.msra.mxu0 %v2917_v13  ;;  %v3337_v13 = vld [vmem:[%s4960_s16 + $0x10] sm:$0xff] }
0x18dd   : > { %3980 = vmatprep.subr.mxu0 %v4227_v8 }
0x18e5   : > { %v4128_v14 = vpop.eup %4127 }
0x18e6   : > { %v2915_v15 = vmul.f32 %v4128_v14, %v4126_v6  ;;  %v3336_v14 = vld [vmem:[%s4960_s16 + $0x8] sm:$0xff] }
0x18e8   : > { %3973 = vmatmul.mubr.msk.f32.vlgmr.msra.gmra.mxu0 %vm799_vm2, %v2915_v15  ;;  %v3335_v15 = vld [vmem:[%s4960_s16] sm:$0xff] }
0x18e9   : > { %3988 = vmatprep.mubr.msk.f32.mxu0 %vm4228_vm1, %v4227_v8  ;;  %3981 = vmatpush3.msra.mxu0 %v3687_v32 }
0x18ea   : > { %3982 = vmatprep.subr.mxu0 %v4227_v8 }
0x18eb   : > { %3983 = vmatpush3.msra.mxu0 %v3686_v33 }
0x18ec   : > { %3984 = vmatprep.subr.mxu0 %v4227_v8 }
0x19a8   : > { %v2988_v58 = vpop.f32.mrf.mxu0 }
0x19a9   : > { %3978 = vmatmul.mubr.msk.f32.vlgmr.msra.gmra.mxu1 %vm799_vm2, %v2988_v58 }
0x19aa   : > { %v3974_v16 = vpop.f32.mrf.mxu0  ;;  %4007 = vmatprep.mubr.msk.f32.mxu1 %vm4228_vm1, %v4227_v8  ;;  %3992 = vmatpush3.msra.mxu1 %v3698_v43 }
0x19ab   : > { %3993 = vmatprep.subr.mxu1 %v4227_v8 }
0x19ac   : > { %3994 = vmatpush3.msra.mxu1 %v3697_v44 }
0x19ad   : > { %3995 = vmatprep.subr.mxu1 %v4227_v8 }
0x19ae   : > { %3996 = vmatpush3.msra.mxu1 %v3696_v45 }
0x19af   : > { %3997 = vmatprep.subr.mxu1 %v4227_v8 }
0x19b0   : > { %3998 = vmatpush3.msra.mxu1 %v3695_v46 }
0x19b1   : > { %3999 = vmatprep.subr.mxu1 %v4227_v8 }
0x19b2   : > { %4000 = vmatpush3.msra.mxu1 %v3694_v47 }
0x19b3   : > { %4001 = vmatprep.subr.mxu1 %v4227_v8 }
0x19b4   : > { %4002 = vmatpush3.msra.mxu1 %v3693_v48 }
0x19b5   : > { %4003 = vmatprep.subr.mxu1 %v4227_v8 }
0x19b6   : > { %4004 = vmatpush3.msra.mxu1 %v3692_v49 }
0x19b7   : > { %4005 = vmatprep.subr.mxu1 %v4227_v8 }
0x19b8   : > { %4006 = vmatpush3.msra.mxu1 %v3691_v50 }
0x1a69   : > { %v3061_v17 = vpop.f32.mrf.mxu1 }
0x1a6a   : > { %v3065_v19 = vadd.f32 %v3061_v17, %v2824_v27 }
0x1a6b   : > { %v3979_v21 = vpop.f32.mrf.mxu1 }
0x1a6c   : > { %v3074_v22 = vadd.f32 %v3679_v18, %v3065_v19  ;;  %v3704_v19 = vld [vmem:[%s4958_s14 + $0x1] ss:$0 sm:$0xff] }
0x1a6e   : > { %v3075_v24 = vadd.f32 %v3074_v22, %v4650_v55  ;;  %v3685_v55 = vld [vmem:[%s5012_s10 + $0x28] sm:$0xff]  ;;  %v3705_v22 = vld [vmem:[%s4959_s15 + $0x1] ss:$0 sm:$0xff] }
0x1a6f   : > { %3985 = vmatpush3.msra.mxu0 %v3685_v55 }
0x1a70   : > { %v3080_v25 = vsel %vm678_vm0, %v3075_v24, 0.0  ;;  %3986 = vmatprep.subr.mxu0 %v4227_v8 }
0x1a71   : > { %3081 = vadd.xlane.f32.xlu1 %v3080_v25  ;;  %3987 = vmatpush3.msra.mxu0 %v3684_v34  ;;  %v3417_v34 = vld [vmem:[%s4962_s18 + $0x18] sm:$0xff] }
0x1a72   : > { %4010 = vmatprep.subr.mxu0 %v4227_v8 }
0x1afa   : > { %v3082_v26 = vpop.xlane.xlu1 %3081 }
0x1afb   : > { %v3083_v28 = vmul.f32 0.03125, %v3082_v26 }
0x1afd   : > { %v3084_v29 = vsub.f32 %v3075_v24, %v3083_v28 }
0x1aff   : > { %v3085_v30 = vmul.f32 %v3084_v29, %v3084_v29 }
0x1b01   : > { %v3086_v31 = vsel %vm678_vm0, %v3085_v30, 0.0 }
0x1b02   : > { %3087 = vadd.xlane.f32.xlu1 %v3086_v31 }
0x1b8b   : > { %v3088_v35 = vpop.xlane.xlu1 %3087 }
0x1b8c   : > { %v3089_v36 = vmul.f32 0.03125, %v3088_v35  ;;  %v3416_v35 = vld [vmem:[%s4962_s18 + $0x10] sm:$0xff] }
0x1b8e   : > { %v3090_v37 = vadd.f32 1e-12, %v3089_v36  ;;  %v3415_v36 = vld [vmem:[%s4962_s18 + $0x8] sm:$0xff] }
0x1b90   : > { %4129 = vrsqrt.f32 %v3090_v37  ;;  %v3414_v37 = vld [vmem:[%s4962_s18] sm:$0xff] }
0x1b9d   : > { %v4130_v38 = vpop.eup %4129 }
0x1b9e   : > { %v3092_v40 = vmul.f32 %v4130_v38, %v3084_v29  ;;  %v3339_v38 = vld [vmem:[%s4961_s17] sm:$0x1] }
0x1ba0   : > { %v3099_v42 = vmul.f32 %v3682_v39, %v3092_v40 }
0x1ba2   : > { %v3106_v23 = vadd.f32 %v3683_v41, %v3099_v42 }
0x1ba4   : > { %3989 = vmatmul.mubr.msk.f32.vlgmr.msra.gmra.mxu0 %vm678_vm0, %v3106_v23 }
0x1ba5   : > { %4018 = vmatprep.mubr.msk.f32.mxu0 %vm4228_vm1, %v4227_v8  ;;  %4011 = vmatpush3.msra.mxu0 %v3338_v12 }
0x1ba6   : > { %4012 = vmatprep.subr.mxu0 %v4227_v8 }
0x1ba7   : > { %4013 = vmatpush3.msra.mxu0 %v3337_v13 }
0x1ba8   : > { %4014 = vmatprep.subr.mxu0 %v4227_v8 }
0x1ba9   : > { %4015 = vmatpush3.msra.mxu0 %v3336_v14 }
0x1baa   : > { %4016 = vmatprep.subr.mxu0 %v4227_v8 }
0x1bab   : > { %4017 = vmatpush3.msra.mxu0 %v3335_v15 }
0x1bac   : > { %4021 = vmatprep.subr.mxu0 %v4227_v8 }
0x1c64   : > { %v3189_v52 = vpop.f32.mrf.mxu0 }
0x1c65   : > { %v3190_v53 = vadd.f32 %v3689_v51, %v3189_v52 }
0x1c66   : > { %v3990_v54 = vpop.f32.mrf.mxu0 }
0x1c67   : > { %v3194_v56 = vmul.f32 0.044715, %v3190_v53  ;;  %v3193_v62 = vmul.f32 0.5, %v3190_v53 }
0x1c69   : > { %v3195_v57 = vmul.f32 %v3194_v56, %v3190_v53 }
0x1c6b   : > { %v3196_v59 = vmul.f32 %v3195_v57, %v3190_v53 }
0x1c6d   : > { %v3197_v60 = vadd.f32 %v3196_v59, %v3190_v53 }
0x1c6f   : > { %v3198_v61 = vmul.f32 0.7978846, %v3197_v60 }
0x1c71   : > { %4131 = vtanh.f32 %v3198_v61 }
0x1c7e   : > { %v4132_v20 = vpop.eup %4131 }
0x1c7f   : > { %v3200_v63 = vadd.f32 1.0, %v4132_v20 }
0x1c81   : > { %v3201_v0 = vmul.f32 %v3200_v63, %v3193_v62 }
0x1c83   : > { %4008 = vmatmul.mubr.msk.f32.vlgmr.msra.gmra.mxu1 %vm1910_vm3, %v3201_v0 }
0x1d43   : > { %v3288_v2 = vpop.f32.mrf.mxu1 }
0x1d44   : > { %v3289_v3 = vadd.f32 %v3700_v1, %v3288_v2 }
0x1d45   : > { %v4009_v4 = vpop.f32.mrf.mxu1 }
0x1d46   : > { %v3292_v5 = vadd.f32 %v3289_v3, %v3106_v23 }
0x1d48   : > { %v3297_v6 = vsel %vm678_vm0, %v3292_v5, 0.0 }
0x1d49   : > { %3298 = vadd.xlane.f32.xlu1 %v3297_v6 }
0x1dd2   : > { %v3299_v7 = vpop.xlane.xlu1 %3298 }
0x1dd3   : > { %v3300_v9 = vmul.f32 0.03125, %v3299_v7 }
0x1dd5   : > { %v3301_v10 = vsub.f32 %v3292_v5, %v3300_v9 }
0x1dd7   : > { %v3302_v27 = vmul.f32 %v3301_v10, %v3301_v10 }
0x1dd9   : > { %v3303_v11 = vsel %vm678_vm0, %v3302_v27, 0.0 }
0x1dda   : > { %3304 = vadd.xlane.f32.xlu1 %v3303_v11 }
0x1e63   : > { %v3305_v58 = vpop.xlane.xlu1 %3304 }
0x1e64   : > { %v3306_v16 = vmul.f32 0.03125, %v3305_v58 }
0x1e66   : > { %v3307_v17 = vadd.f32 1e-12, %v3306_v16 }
0x1e68   : > { %4133 = vrsqrt.f32 %v3307_v17 }
0x1e75   : > { %v4134_v18 = vpop.eup %4133 }
0x1e76   : > { %v3309_v21 = vmul.f32 %v4134_v18, %v3301_v10 }
0x1e78   : > { %v3316_v24 = vmul.f32 %v3704_v19, %v3309_v21 }
0x1e7a   : > { %v3323_v25 = vadd.f32 %v3705_v22, %v3316_v24 }
0x1e7c   : > { %v3324_v26 = vsel %vm678_vm0, %v3323_v25, 0.0 }
0x1e7d   : > { %v3325_v28 = vrot.slane %v3324_v26, 4 }
0x1e7f   : > { %v3326_v29 = vadd.f32 %v3325_v28, %v3324_v26 }
0x1e81   : > { %v3327_v30 = vrot.slane %v3326_v29, 2 }
0x1e83   : > { %v3328_v31 = vadd.f32 %v3327_v30, %v3326_v29 }
0x1e85   : > { %v3329_v32 = vrot.slane %v3328_v31, 1 }
0x1e87   : > { %v3330_v33 = vadd.f32 %v3329_v32, %v3328_v31 }
0x1e89   : > { %v3332_v55 = vmul.f32 0.125, %v3330_v33 }
0x1e8b   : > { %4019 = vmatmul.mubr.msk.f32.vlgmr.msra.gmra.mxu0 %vm678_vm0, %v3332_v55  ;;  %3334 = vst.msk [vmem:[%s661_s2] sm:$0x1] %vm3333_vm4, %v3332_v55 }
0x1e8c   : > { %4022 = vmatpush3.msra.mxu0 %v3417_v34  ;;  %4029 = vmatprep.mubr.msk.f32.mxu0 %vm4228_vm1, %v4227_v8 }
0x1e8d   : > { %4023 = vmatprep.subr.mxu0 %v4227_v8 }
0x1e8e   : > { %4024 = vmatpush3.msra.mxu0 %v3416_v35 }
0x1e8f   : > { %4025 = vmatprep.subr.mxu0 %v4227_v8 }
0x1e90   : > { %4026 = vmatpush3.msra.mxu0 %v3415_v36 }
0x1e91   : > { %4027 = vmatprep.subr.mxu0 %v4227_v8 }
0x1e92   : > { %4028 = vmatpush3.msra.mxu0 %v3414_v37 }
0x1f4b   : > { %v3409_v39 = vpop.f32.mrf.mxu0 }
0x1f4c   : > { %v3410_v40 = vadd.f32 %v3409_v39, %v3339_v38 }
0x1f4d   : > { %v4020_v41 = vpop.f32.mrf.mxu0 }
0x1f4e   : > { %v3413_v42 = vmax.f32 %v3410_v40, 0.0 }
0x1f50   : > { %4030 = vmatmul.mubr.msk.f32.vlgmr.msra.gmra.mxu0 %vm678_vm0, %v3413_v42 }
0x1f51   : > { %4148 = shalt.err (!%p4145_p3)
}
0x1f52   : > { %s4149_s8 = scalar_lea.hbm %s3509_s4, 16  ;;  %s4153_s26 = scalar_lea.hbm %s4964_s20, 32 }
0x1f53   : > { %p4150_p4 = scmp.ne.s32.totalorder %s3509_s4, %s4149_s8  ;;  %p4154_p9 = scmp.lt.s32.totalorder %s3509_s4, %s4964_s20 }
0x1f54   : > { %p4155_p10 = scmp.lt.s32.totalorder %s4153_s26, %s4149_s8 }
0x1f55   : > { %p4151_p7 = pnand %p4150_p4, %p4390_p5 }
0x1f56   : > { %p4156_p11 = por %p4155_p10, %p4154_p9 }
0x1f57   : > { %p4152_p8 = pneg %p4151_p7 }
0x1f59   : > { %p4157_p12 = pnand %p4156_p11, %p4152_p8 }
0x1f5b   : > { %4160 = shalt.err (!%p4157_p12)
}
0x1f5c   : > { %4032 = dma.vmem_to_hbm [thread:$0]  (%p4390_p5), %s3512_s24, 16, %s3509_s4, %s3495_s0   ;;  %v3418_v8 = vld [vmem:[%s4963_s19] sm:$0x1]  ;;  %vm3492_vm5 = vcmask 8192  }
0x1f5d   : > { %s667_s30 = scalar_lea.vmem [#allocation4], %s4855_s28  ;;  %s5024_s8 = sshll.u32 %s4373_s3, 4 }
0x1f5e   : > { %s3524_s22 = sshll.u32 %s667_s30, 4  ;;  %s5025_s2 = sld [smem:[#allocation24_spill]]  ;;  %s3525_s22 = int_to_ptr.vmem [resolvable:$true] %s3524_s22 }
0x1f5f   : > { %s3499_s10 = scalar_lea.sflag [#allocation5], %s4855_s28  ;;  %s4161_s4 = scalar_lea.vmem %s3525_s22, 16 }
0x1f60   : > { %p4162_p13 = scmp.ne.s32.totalorder %s3525_s22, %s4161_s4  ;;  %s4241_s24 = smov [#allocation4]  }
0x1f61   : > { %s4165_s0 = sshll.u32 %s4241_s24, 4  ;;  %s4166_s0 = int_to_ptr.vmem [resolvable:$false] %s4165_s0 }
0x1f62   : > { %p4163_p0 = pnand %p4162_p13, %p4390_p5  ;;  %s4167_s6 = scalar_lea.vmem %s4166_s0, 32 }
0x1f63   : > { %p4168_p2 = scmp.lt.s32.totalorder %s3525_s22, %s4166_s0  ;;  %p4169_p3 = scmp.lt.s32.totalorder %s4167_s6, %s4161_s4 }
0x1f64   : > { %s5026_s23 = smov %s5025_s2  ;;  %s4908_s26 = scalar_lea.hbm %s5025_s2, %s5024_s8 }
0x1f65   : > { %p4164_p1 = pneg %p4163_p0  ;;  %p4170_p4 = por %p4169_p3, %p4168_p2 }
0x1f67   : > { %p4171_p7 = pnand %p4170_p4, %p4164_p1 }
0x2010   : > { %v3488_v23 = vpop.f32.mrf.mxu0 }
0x2011   : > { %v3489_v43 = vadd.f32 %v3488_v23, %v3418_v8 }
0x2012   : > { %v4031_v44 = vpop.f32.mrf.mxu0 }
0x2013   : > { %3493 = vst.msk [vmem:[%s667_s30] sm:$0x1] %vm3492_vm5, %v3489_v43 }
0x2014   : > { %4174 = shalt.err (!%p4171_p7)
}
0x2015   : > { %s4175_s3 = scalar_lea.hbm %s4908_s26, 16  ;;  %s4179_s30 = scalar_lea.hbm %s5026_s23, 32 }
0x2016   : > { %p4176_p8 = scmp.ne.s32.totalorder %s4908_s26, %s4175_s3  ;;  %p4180_p11 = scmp.lt.s32.totalorder %s4908_s26, %s5026_s23 }
0x2017   : > { %p4181_p12 = scmp.lt.s32.totalorder %s4179_s30, %s4175_s3 }
0x2018   : > { %p4177_p9 = pnand %p4176_p8, %p4390_p5 }
0x2019   : > { %p4182_p13 = por %p4181_p12, %p4180_p11 }
0x201a   : > { %p4178_p10 = pneg %p4177_p9 }
0x201c   : > { %p4183_p0 = pnand %p4182_p13, %p4178_p10 }
0x201e   : > { %4186 = shalt.err (!%p4183_p0)
}
0x201f   : > { %4033 = dma.vmem_to_hbm [thread:$0]  (%p4390_p5), %s3525_s22, 16, %s4908_s26, %s3499_s10  }
0x2020 PF: > { %s5027_s1 = sld [smem:[#allocation8_spill]]  ;;  %p4043_p1 = scmp.ge.s32.totalorder %s4225_s27, 2 }
0x2022   : > { %p4037_p2 = pnand %p4043_p1, %p4394_p6 }
0x2024   : > { %p4038_p3 = pneg %p4037_p2 }
0x2026   : > { %s3536_s4 = sand.u32 1, %s5027_s1  }
0x2027   : > { %s3537_s24 = scalar_lea.sflag [#allocation3], %s3536_s4 }
0x2028   : > { %4204 = dma.done.wait (%p4038_p3), %s3537_s24, 16  }
0x2029   : > { %4206 = vsyncadd (%p4038_p3), %s3537_s24, 4294967280  ;;  %s3545_s0 = scalar_lea.sflag [#allocation5], %s3536_s4 }
0x202a   : > { %4208 = dma.done.wait (%p4038_p3), %s3545_s0, 16  }
0x202b   : > { %4210 = vsyncadd (%p4038_p3), %s3545_s0, 4294967280  ;;  %s5029_s27 = sld [smem:[#allocation10_spill]]  ;;  %s5032_s2 = smov %s4217_s25 }
0x202c   : > { %s5030_s5 = sld [smem:[#allocation9_spill]] }
0x202d   : > { %s5031_s26 = sld [smem:[#allocation11_spill]] }
0x2031   : > { %p35_p5 = scmp.ge.s32.totalorder %s5029_s27, 4  }
0x2032   : > { %s5033_s25 = smov %s5030_s5 }
0x2033   :  { %37 = sbr.rel (!%p35_p5) target bundleno = 18 (0x12), region = 167 }
0x2038   :  { %3549 = vsyncpa [#allocation3], 1 }
0x2039   :  { %3551 = vsyncpa [#allocation3 + $0x1], 1 }
0x203a   :  { %3552 = vsyncpa [#allocation5], 1 }
0x203b   :  { %3554 = vsyncpa [#allocation5 + $0x1], 1 }

</bundles_post_ra>
